<compile_context>
chip_gen: v6e
topology: v6e:2x2x1
jax: 0.10.0
libtpu: 0.0.40
codegen_flags: <defaults>
</compile_context>

<pallas_src>
import jax
import jax.numpy as jnp
from jax.experimental import pallas as pl


# ----------------------------------------------------------------------------
# Fused Pallas kernel: entire ContentEncoderBlock forward
# ----------------------------------------------------------------------------
def content_encoder_kernel(x_ref, w0_ref, b0_ref, w1_ref, b1_ref,
                           w2_ref, b2_ref, w3_ref, b3_ref, o_ref):
    # x_ref: (N, L, C) lane-dense activations (C on lanes)
    # wK_ref: (taps*C, C) tap-concatenated conv weights, bK_ref: (1, C)
    # o_ref: (N, L//2, C)
    n, l, c = x_ref.shape
    lo = l // 2
    f32 = jnp.float32

    x2 = x_ref[...].reshape(n * l, c)                       # (N*L, C)

    # --- constant selection / shift matrices (iota-built, tiny) -------------
    # shift-by-one inside each batch element, zero at the conv pad positions
    r_s = jax.lax.broadcasted_iota(jnp.int32, (n * l, n * l), 0)
    c_s = jax.lax.broadcasted_iota(jnp.int32, (n * l, n * l), 1)
    prev_m = jnp.logical_and(c_s == r_s - 1, r_s % l != 0).astype(f32)      # h[l-1]
    next_m = jnp.logical_and(c_s == r_s + 1, r_s % l != l - 1).astype(f32)  # h[l+1]

    # stride-2 row selectors (k=4/s=2 conv taps and AvgPool1d(2,2))
    r_d = jax.lax.broadcasted_iota(jnp.int32, (n * lo, n * l), 0)
    c_d = jax.lax.broadcasted_iota(jnp.int32, (n * lo, n * l), 1)
    lo_in = r_d % lo
    t0 = jnp.logical_and(c_d == 2 * r_d - 1, lo_in != 0).astype(f32)        # h[2lo-1]
    t1 = (c_d == 2 * r_d).astype(f32)                                       # h[2lo]
    t2 = (c_d == 2 * r_d + 1).astype(f32)                                   # h[2lo+1]
    t3 = jnp.logical_and(c_d == 2 * r_d + 2, lo_in != lo - 1).astype(f32)   # h[2lo+2]

    def instance_norm(y2, length):
        # nn.InstanceNorm1d: per (batch, channel) stats over length,
        # biased variance, eps=1e-5, no affine.
        ch = y2.shape[1]
        y3 = y2.reshape(n, length, ch)
        mean = jnp.mean(y3, axis=1, keepdims=True)
        var = jnp.mean(jnp.square(y3 - mean), axis=1, keepdims=True)
        y3 = (y3 - mean) * jax.lax.rsqrt(var + 1e-5)
        return y3.reshape(n * length, ch)

    def conv3_block(h2, w, b):
        # Conv1d(k=3, s=1, p=1) + ReLU + InstanceNorm1d ; h2: (N*L, C)
        h_m1 = jnp.dot(prev_m, h2, preferred_element_type=f32)   # zero-padded shift
        h_p1 = jnp.dot(next_m, h2, preferred_element_type=f32)
        xcat = jnp.concatenate([h_m1, h2, h_p1], axis=1)         # (N*L, 3C)
        y = jnp.dot(xcat, w, preferred_element_type=f32) + b
        y = jnp.maximum(y, 0.0)
        return instance_norm(y, l)

    def conv4s2_block(h2, w, b):
        # Conv1d(k=4, s=2, p=1) + ReLU + InstanceNorm1d ; (N*L, C) -> (N*Lo, C)
        taps = [jnp.dot(t, h2, preferred_element_type=f32) for t in (t0, t1, t2, t3)]
        xcat = jnp.concatenate(taps, axis=1)                     # (N*Lo, 4C)
        y = jnp.dot(xcat, w, preferred_element_type=f32) + b
        y = jnp.maximum(y, 0.0)
        return instance_norm(y, lo)

    # --- c0 ------------------------------------------------------------------
    h = conv3_block(x2, w0_ref[...], b0_ref[...])
    h = conv3_block(h, w1_ref[...], b1_ref[...])
    h = h + x2
    # --- c1 ------------------------------------------------------------------
    h = conv3_block(h, w2_ref[...], b2_ref[...])
    h = conv4s2_block(h, w3_ref[...], b3_ref[...])
    # --- residual with AvgPool1d(2, 2, 0)(x) ----------------------------------
    pool = 0.5 * (jnp.dot(t1, x2, preferred_element_type=f32)
                  + jnp.dot(t2, x2, preferred_element_type=f32))
    h = h + pool

    o_ref[...] = h.reshape(n, lo, c).astype(o_ref.dtype)


# ----------------------------------------------------------------------------
# Wrapper (PyTorch (N, C, L) layout at the boundary, lane-dense inside)
# ----------------------------------------------------------------------------
@jax.jit
def content_encoder_block_forward(x, params):
    """x: (N, C, L) -> (N, C, L // 2). Requires in_ch == out_ch (as the module does)."""
    n, c, l = x.shape
    xt = jnp.transpose(x, (0, 2, 1))                       # (N, L, C), lanes = C
    out_t = pl.pallas_call(
        content_encoder_kernel,
        out_shape=jax.ShapeDtypeStruct((n, l // 2, c), jnp.float32),
    )(xt,
      params["w0"], params["b0"], params["w1"], params["b1"],
      params["w2"], params["b2"], params["w3"], params["b3"])
    return jnp.transpose(out_t, (0, 2, 1))                 # back to (N, C, L//2)


# ----------------------------------------------------------------------------
# Parameter init (torch-default uniform) and layout prep for the kernel
# ----------------------------------------------------------------------------
def init_conv_torch(key, cin, cout, k):
    """Conv1d params in torch layout: weight (O, C, K), bias (O,)."""
    kw, kb = jax.random.split(key)
    bound = 1.0 / float((cin * k) ** 0.5)
    w = jax.random.uniform(kw, (cout, cin, k), jnp.float32, -bound, bound)
    b = jax.random.uniform(kb, (cout,), jnp.float32, -bound, bound)
    return w, b


def prep_conv(w, b):
    """(O, C, K) -> tap-concatenated (K*C, O) matmul weight; bias -> (1, O)."""
    o, c, k = w.shape
    w_cat = jnp.concatenate([w[:, :, i].T for i in range(k)], axis=0)
    return w_cat.astype(jnp.float32), b.reshape(1, o).astype(jnp.float32)


# ----------------------------------------------------------------------------
# Pure-JAX reference of the PyTorch module (for a numerical sanity check)
# ----------------------------------------------------------------------------
def _ref_conv1d(x, w, b, stride):
    xp = jnp.pad(x, ((0, 0), (0, 0), (1, 1)))
    k = w.shape[2]
    lout = (x.shape[2] + 2 - k) // stride + 1
    cols = jnp.stack([xp[:, :, i:i + stride * lout:stride] for i in range(k)], axis=-1)
    y = jnp.einsum("nclk,ock->nol", cols, w, precision=jax.lax.Precision.HIGHEST)
    return y + b[None, :, None]


def _ref_block(x, w, b, stride):
    y = jnp.maximum(_ref_conv1d(x, w, b, stride), 0.0)
    mean = jnp.mean(y, axis=2, keepdims=True)
    var = jnp.mean(jnp.square(y - mean), axis=2, keepdims=True)
    return (y - mean) / jnp.sqrt(var + 1e-5)


def _ref_forward(x, raw):
    h = _ref_block(x, raw["w0"], raw["b0"], 1)
    h = _ref_block(h, raw["w1"], raw["b1"], 1)
    h = h + x
    h = _ref_block(h, raw["w2"], raw["b2"], 1)
    h = _ref_block(h, raw["w3"], raw["b3"], 2)
    pool = 0.5 * (x[:, :, 0::2] + x[:, :, 1::2])
    return h + pool


# ----------------------------------------------------------------------------
if __name__ == "__main__":
    # in_ch == out_ch is required by the residual adds in the reference module.
    N, CH, L = 2, 128, 16

    key = jax.random.PRNGKey(0)
    kx, k0, k1, k2, k3 = jax.random.split(key, 5)
    x = jax.random.normal(kx, (N, CH, L), jnp.float32)

    raw, params = {}, {}
    for name, kk, ksz in (("0", k0, 3), ("1", k1, 3), ("2", k2, 3), ("3", k3, 4)):
        w, b = init_conv_torch(kk, CH, CH, ksz)
        raw["w" + name], raw["b" + name] = w, b
        params["w" + name], params["b" + name] = prep_conv(w, b)

    out = jax.block_until_ready(content_encoder_block_forward(x, params))

    assert out.shape == (N, CH, L // 2), out.shape
    assert bool(jnp.all(jnp.isfinite(out)))

    # sanity-check the fused kernel against a pure-JAX reference of the module
    ref = _ref_forward(x, raw)
    max_err = float(jnp.max(jnp.abs(out - ref)))
    assert max_err < 5e-2, f"max abs err vs reference = {max_err}"

    print("KERNEL_OK")
</pallas_src>

<mosaic_0001>
module attributes {stable_mosaic.version = 11 : i64} {
  func.func @content_encoder_kernel(%arg0: memref<2x16x128xf32, #tpu.memory_space<vmem>>, %arg1: memref<384x128xf32, #tpu.memory_space<vmem>>, %arg2: memref<1x128xf32, #tpu.memory_space<vmem>>, %arg3: memref<384x128xf32, #tpu.memory_space<vmem>>, %arg4: memref<1x128xf32, #tpu.memory_space<vmem>>, %arg5: memref<384x128xf32, #tpu.memory_space<vmem>>, %arg6: memref<1x128xf32, #tpu.memory_space<vmem>>, %arg7: memref<512x128xf32, #tpu.memory_space<vmem>>, %arg8: memref<1x128xf32, #tpu.memory_space<vmem>>, %arg9: memref<2x8x128xf32, #tpu.memory_space<vmem>>) attributes {dimension_semantics = [], scalar_prefetch = 0 : i64, scratch_operands = 0 : i64, tpu.core_type = #tpu.core_type<tc>} {
    %c0 = arith.constant 0 : index
    %c0_0 = arith.constant 0 : index
    %c0_1 = arith.constant 0 : index
    %0 = vector.load %arg0[%c0, %c0_0, %c0_1] : memref<2x16x128xf32, #tpu.memory_space<vmem>>, vector<2x16x128xf32>
    %1 = vector.shape_cast %0 : vector<2x16x128xf32> to vector<32x128xf32>
    %2 = tpu.iota {dimensions = array<i32: 0>} : vector<32x32xi32>
    %3 = tpu.iota {dimensions = array<i32: 1>} : vector<32x32xi32>
    %c1_i32 = arith.constant 1 : i32
    %4 = vector.broadcast %c1_i32 : i32 to vector<32x32xi32>
    %5 = arith.subi %2, %4 : vector<32x32xi32>
    %6 = arith.cmpi eq, %3, %5 : vector<32x32xi32>
    %c16_i32 = arith.constant 16 : i32
    %c0_i32 = arith.constant 0 : i32
    %7 = arith.cmpi eq, %c16_i32, %c0_i32 : i32
    %c1_i32_2 = arith.constant 1 : i32
    %8 = arith.select %7, %c1_i32_2, %c16_i32 : i32
    %9 = vector.broadcast %8 : i32 to vector<32x32xi32>
    %10 = arith.remsi %2, %9 : vector<32x32xi32>
    %c0_i32_3 = arith.constant 0 : i32
    %11 = vector.broadcast %c0_i32_3 : i32 to vector<32x32xi32>
    %12 = arith.cmpi ne, %10, %11 : vector<32x32xi32>
    %c0_i32_4 = arith.constant 0 : i32
    %13 = vector.broadcast %c0_i32_4 : i32 to vector<32x32xi32>
    %14 = arith.cmpi slt, %10, %13 : vector<32x32xi32>
    %c0_i32_5 = arith.constant 0 : i32
    %15 = arith.cmpi slt, %8, %c0_i32_5 : i32
    %16 = vector.broadcast %15 : i1 to vector<32x32xi1>
    %17 = vector.broadcast %16 : vector<32x32xi1> to vector<32x32xi1>
    %18 = arith.xori %14, %17 : vector<32x32xi1>
    %19 = arith.andi %18, %12 : vector<32x32xi1>
    %20 = vector.broadcast %8 : i32 to vector<32x32xi32>
    %21 = arith.addi %10, %20 : vector<32x32xi32>
    %22 = arith.select %19, %21, %10 : vector<32x32xi1>, vector<32x32xi32>
    %c0_i32_6 = arith.constant 0 : i32
    %23 = vector.broadcast %c0_i32_6 : i32 to vector<32x32xi32>
    %24 = arith.cmpi ne, %22, %23 : vector<32x32xi32>
    %25 = arith.andi %6, %24 : vector<32x32xi1>
    %26 = arith.extui %25 : vector<32x32xi1> to vector<32x32xi32>
    %27 = arith.sitofp %26 : vector<32x32xi32> to vector<32x32xf32>
    %c1_i32_7 = arith.constant 1 : i32
    %28 = vector.broadcast %c1_i32_7 : i32 to vector<32x32xi32>
    %29 = arith.addi %2, %28 : vector<32x32xi32>
    %30 = arith.cmpi eq, %3, %29 : vector<32x32xi32>
    %c16_i32_8 = arith.constant 16 : i32
    %c0_i32_9 = arith.constant 0 : i32
    %31 = arith.cmpi eq, %c16_i32_8, %c0_i32_9 : i32
    %c1_i32_10 = arith.constant 1 : i32
    %32 = arith.select %31, %c1_i32_10, %c16_i32_8 : i32
    %33 = vector.broadcast %32 : i32 to vector<32x32xi32>
    %34 = arith.remsi %2, %33 : vector<32x32xi32>
    %c0_i32_11 = arith.constant 0 : i32
    %35 = vector.broadcast %c0_i32_11 : i32 to vector<32x32xi32>
    %36 = arith.cmpi ne, %34, %35 : vector<32x32xi32>
    %c0_i32_12 = arith.constant 0 : i32
    %37 = vector.broadcast %c0_i32_12 : i32 to vector<32x32xi32>
    %38 = arith.cmpi slt, %34, %37 : vector<32x32xi32>
    %c0_i32_13 = arith.constant 0 : i32
    %39 = arith.cmpi slt, %32, %c0_i32_13 : i32
    %40 = vector.broadcast %39 : i1 to vector<32x32xi1>
    %41 = vector.broadcast %40 : vector<32x32xi1> to vector<32x32xi1>
    %42 = arith.xori %38, %41 : vector<32x32xi1>
    %43 = arith.andi %42, %36 : vector<32x32xi1>
    %44 = vector.broadcast %32 : i32 to vector<32x32xi32>
    %45 = arith.addi %34, %44 : vector<32x32xi32>
    %46 = arith.select %43, %45, %34 : vector<32x32xi1>, vector<32x32xi32>
    %c15_i32 = arith.constant 15 : i32
    %47 = vector.broadcast %c15_i32 : i32 to vector<32x32xi32>
    %48 = arith.cmpi ne, %46, %47 : vector<32x32xi32>
    %49 = arith.andi %30, %48 : vector<32x32xi1>
    %50 = arith.extui %49 : vector<32x32xi1> to vector<32x32xi32>
    %51 = arith.sitofp %50 : vector<32x32xi32> to vector<32x32xf32>
    %52 = tpu.iota {dimensions = array<i32: 0>} : vector<16x32xi32>
    %53 = tpu.iota {dimensions = array<i32: 1>} : vector<16x32xi32>
    %c8_i32 = arith.constant 8 : i32
    %c0_i32_14 = arith.constant 0 : i32
    %54 = arith.cmpi eq, %c8_i32, %c0_i32_14 : i32
    %c1_i32_15 = arith.constant 1 : i32
    %55 = arith.select %54, %c1_i32_15, %c8_i32 : i32
    %56 = vector.broadcast %55 : i32 to vector<16x32xi32>
    %57 = arith.remsi %52, %56 : vector<16x32xi32>
    %c0_i32_16 = arith.constant 0 : i32
    %58 = vector.broadcast %c0_i32_16 : i32 to vector<16x32xi32>
    %59 = arith.cmpi ne, %57, %58 : vector<16x32xi32>
    %c0_i32_17 = arith.constant 0 : i32
    %60 = vector.broadcast %c0_i32_17 : i32 to vector<16x32xi32>
    %61 = arith.cmpi slt, %57, %60 : vector<16x32xi32>
    %c0_i32_18 = arith.constant 0 : i32
    %62 = arith.cmpi slt, %55, %c0_i32_18 : i32
    %63 = vector.broadcast %62 : i1 to vector<16x32xi1>
    %64 = vector.broadcast %63 : vector<16x32xi1> to vector<16x32xi1>
    %65 = arith.xori %61, %64 : vector<16x32xi1>
    %66 = arith.andi %65, %59 : vector<16x32xi1>
    %67 = vector.broadcast %55 : i32 to vector<16x32xi32>
    %68 = arith.addi %57, %67 : vector<16x32xi32>
    %69 = arith.select %66, %68, %57 : vector<16x32xi1>, vector<16x32xi32>
    %c2_i32 = arith.constant 2 : i32
    %70 = vector.broadcast %c2_i32 : i32 to vector<16x32xi32>
    %71 = arith.muli %70, %52 : vector<16x32xi32>
    %c1_i32_19 = arith.constant 1 : i32
    %72 = vector.broadcast %c1_i32_19 : i32 to vector<16x32xi32>
    %73 = arith.subi %71, %72 : vector<16x32xi32>
    %74 = arith.cmpi eq, %53, %73 : vector<16x32xi32>
    %c0_i32_20 = arith.constant 0 : i32
    %75 = vector.broadcast %c0_i32_20 : i32 to vector<16x32xi32>
    %76 = arith.cmpi ne, %69, %75 : vector<16x32xi32>
    %77 = arith.andi %74, %76 : vector<16x32xi1>
    %78 = arith.extui %77 : vector<16x32xi1> to vector<16x32xi32>
    %79 = arith.sitofp %78 : vector<16x32xi32> to vector<16x32xf32>
    %c2_i32_21 = arith.constant 2 : i32
    %80 = vector.broadcast %c2_i32_21 : i32 to vector<16x32xi32>
    %81 = arith.muli %80, %52 : vector<16x32xi32>
    %82 = arith.cmpi eq, %53, %81 : vector<16x32xi32>
    %83 = arith.extui %82 : vector<16x32xi1> to vector<16x32xi32>
    %84 = arith.sitofp %83 : vector<16x32xi32> to vector<16x32xf32>
    %c2_i32_22 = arith.constant 2 : i32
    %85 = vector.broadcast %c2_i32_22 : i32 to vector<16x32xi32>
    %86 = arith.muli %85, %52 : vector<16x32xi32>
    %c1_i32_23 = arith.constant 1 : i32
    %87 = vector.broadcast %c1_i32_23 : i32 to vector<16x32xi32>
    %88 = arith.addi %86, %87 : vector<16x32xi32>
    %89 = arith.cmpi eq, %53, %88 : vector<16x32xi32>
    %90 = arith.extui %89 : vector<16x32xi1> to vector<16x32xi32>
    %91 = arith.sitofp %90 : vector<16x32xi32> to vector<16x32xf32>
    %c2_i32_24 = arith.constant 2 : i32
    %92 = vector.broadcast %c2_i32_24 : i32 to vector<16x32xi32>
    %93 = arith.muli %92, %52 : vector<16x32xi32>
    %c2_i32_25 = arith.constant 2 : i32
    %94 = vector.broadcast %c2_i32_25 : i32 to vector<16x32xi32>
    %95 = arith.addi %93, %94 : vector<16x32xi32>
    %96 = arith.cmpi eq, %53, %95 : vector<16x32xi32>
    %c7_i32 = arith.constant 7 : i32
    %97 = vector.broadcast %c7_i32 : i32 to vector<16x32xi32>
    %98 = arith.cmpi ne, %69, %97 : vector<16x32xi32>
    %99 = arith.andi %96, %98 : vector<16x32xi1>
    %100 = arith.extui %99 : vector<16x32xi1> to vector<16x32xi32>
    %101 = arith.sitofp %100 : vector<16x32xi32> to vector<16x32xf32>
    %c0_26 = arith.constant 0 : index
    %c0_27 = arith.constant 0 : index
    %102 = vector.load %arg1[%c0_26, %c0_27] : memref<384x128xf32, #tpu.memory_space<vmem>>, vector<384x128xf32>
    %c0_28 = arith.constant 0 : index
    %c0_29 = arith.constant 0 : index
    %103 = vector.load %arg2[%c0_28, %c0_29] : memref<1x128xf32, #tpu.memory_space<vmem>>, vector<1x128xf32>
    %cst = arith.constant dense<0.000000e+00> : vector<32x128xf32>
    %104 = tpu.matmul %27, %1, %cst {dimension_numbers = #tpu.dot_dimension_numbers<[1], [0], [0], [1], [0, 0, 1, 1], [], []>} : vector<32x32xf32>, vector<32x128xf32>, vector<32x128xf32> -> vector<32x128xf32>
    %cst_30 = arith.constant dense<0.000000e+00> : vector<32x128xf32>
    %105 = tpu.matmul %51, %1, %cst_30 {dimension_numbers = #tpu.dot_dimension_numbers<[1], [0], [0], [1], [0, 0, 1, 1], [], []>} : vector<32x32xf32>, vector<32x128xf32>, vector<32x128xf32> -> vector<32x128xf32>
    %106 = tpu.concatenate %104, %1, %105 in 1 : vector<32x128xf32>, vector<32x128xf32>, vector<32x128xf32> -> vector<32x384xf32>
    %cst_31 = arith.constant dense<0.000000e+00> : vector<32x128xf32>
    %107 = tpu.matmul %106, %102, %cst_31 {dimension_numbers = #tpu.dot_dimension_numbers<[1], [0], [0], [1], [0, 0, 1, 1], [], []>} : vector<32x384xf32>, vector<384x128xf32>, vector<32x128xf32> -> vector<32x128xf32>
    %108 = vector.broadcast %103 : vector<1x128xf32> to vector<32x128xf32>
    %109 = arith.addf %107, %108 : vector<32x128xf32>
    %cst_32 = arith.constant 0.000000e+00 : f32
    %110 = vector.broadcast %cst_32 : f32 to vector<32x128xf32>
    %111 = arith.maximumf %109, %110 : vector<32x128xf32>
    %112 = vector.shape_cast %111 : vector<32x128xf32> to vector<2x16x128xf32>
    %cst_33 = arith.constant dense<0.000000e+00> : vector<2x128xf32>
    %113 = vector.multi_reduction <add>, %112, %cst_33 [1] : vector<2x16x128xf32> to vector<2x128xf32>
    %114 = vector.shape_cast %113 : vector<2x128xf32> to vector<2x1x128xf32>
    %cst_34 = arith.constant 1.600000e+01 : f32
    %115 = vector.broadcast %cst_34 : f32 to vector<2x1x128xf32>
    %116 = arith.divf %114, %115 : vector<2x1x128xf32>
    %117 = vector.broadcast %116 : vector<2x1x128xf32> to vector<2x16x128xf32>
    %118 = arith.subf %112, %117 : vector<2x16x128xf32>
    %119 = arith.mulf %118, %118 : vector<2x16x128xf32>
    %cst_35 = arith.constant dense<0.000000e+00> : vector<2x128xf32>
    %120 = vector.multi_reduction <add>, %119, %cst_35 [1] : vector<2x16x128xf32> to vector<2x128xf32>
    %121 = vector.shape_cast %120 : vector<2x128xf32> to vector<2x1x128xf32>
    %cst_36 = arith.constant 1.600000e+01 : f32
    %122 = vector.broadcast %cst_36 : f32 to vector<2x1x128xf32>
    %123 = arith.divf %121, %122 : vector<2x1x128xf32>
    %124 = vector.broadcast %116 : vector<2x1x128xf32> to vector<2x16x128xf32>
    %125 = arith.subf %112, %124 : vector<2x16x128xf32>
    %cst_37 = arith.constant 9.99999974E-6 : f32
    %126 = vector.broadcast %cst_37 : f32 to vector<2x1x128xf32>
    %127 = arith.addf %123, %126 : vector<2x1x128xf32>
    %128 = math.rsqrt %127 : vector<2x1x128xf32>
    %129 = vector.broadcast %128 : vector<2x1x128xf32> to vector<2x16x128xf32>
    %130 = arith.mulf %125, %129 : vector<2x16x128xf32>
    %131 = vector.shape_cast %130 : vector<2x16x128xf32> to vector<32x128xf32>
    %c0_38 = arith.constant 0 : index
    %c0_39 = arith.constant 0 : index
    %132 = vector.load %arg3[%c0_38, %c0_39] : memref<384x128xf32, #tpu.memory_space<vmem>>, vector<384x128xf32>
    %c0_40 = arith.constant 0 : index
    %c0_41 = arith.constant 0 : index
    %133 = vector.load %arg4[%c0_40, %c0_41] : memref<1x128xf32, #tpu.memory_space<vmem>>, vector<1x128xf32>
    %cst_42 = arith.constant dense<0.000000e+00> : vector<32x128xf32>
    %134 = tpu.matmul %27, %131, %cst_42 {dimension_numbers = #tpu.dot_dimension_numbers<[1], [0], [0], [1], [0, 0, 1, 1], [], []>} : vector<32x32xf32>, vector<32x128xf32>, vector<32x128xf32> -> vector<32x128xf32>
    %cst_43 = arith.constant dense<0.000000e+00> : vector<32x128xf32>
    %135 = tpu.matmul %51, %131, %cst_43 {dimension_numbers = #tpu.dot_dimension_numbers<[1], [0], [0], [1], [0, 0, 1, 1], [], []>} : vector<32x32xf32>, vector<32x128xf32>, vector<32x128xf32> -> vector<32x128xf32>
    %136 = tpu.concatenate %134, %131, %135 in 1 : vector<32x128xf32>, vector<32x128xf32>, vector<32x128xf32> -> vector<32x384xf32>
    %cst_44 = arith.constant dense<0.000000e+00> : vector<32x128xf32>
    %137 = tpu.matmul %136, %132, %cst_44 {dimension_numbers = #tpu.dot_dimension_numbers<[1], [0], [0], [1], [0, 0, 1, 1], [], []>} : vector<32x384xf32>, vector<384x128xf32>, vector<32x128xf32> -> vector<32x128xf32>
    %138 = vector.broadcast %133 : vector<1x128xf32> to vector<32x128xf32>
    %139 = arith.addf %137, %138 : vector<32x128xf32>
    %cst_45 = arith.constant 0.000000e+00 : f32
    %140 = vector.broadcast %cst_45 : f32 to vector<32x128xf32>
    %141 = arith.maximumf %139, %140 : vector<32x128xf32>
    %142 = vector.shape_cast %141 : vector<32x128xf32> to vector<2x16x128xf32>
    %cst_46 = arith.constant dense<0.000000e+00> : vector<2x128xf32>
    %143 = vector.multi_reduction <add>, %142, %cst_46 [1] : vector<2x16x128xf32> to vector<2x128xf32>
    %144 = vector.shape_cast %143 : vector<2x128xf32> to vector<2x1x128xf32>
    %cst_47 = arith.constant 1.600000e+01 : f32
    %145 = vector.broadcast %cst_47 : f32 to vector<2x1x128xf32>
    %146 = arith.divf %144, %145 : vector<2x1x128xf32>
    %147 = vector.broadcast %146 : vector<2x1x128xf32> to vector<2x16x128xf32>
    %148 = arith.subf %142, %147 : vector<2x16x128xf32>
    %149 = arith.mulf %148, %148 : vector<2x16x128xf32>
    %cst_48 = arith.constant dense<0.000000e+00> : vector<2x128xf32>
    %150 = vector.multi_reduction <add>, %149, %cst_48 [1] : vector<2x16x128xf32> to vector<2x128xf32>
    %151 = vector.shape_cast %150 : vector<2x128xf32> to vector<2x1x128xf32>
    %cst_49 = arith.constant 1.600000e+01 : f32
    %152 = vector.broadcast %cst_49 : f32 to vector<2x1x128xf32>
    %153 = arith.divf %151, %152 : vector<2x1x128xf32>
    %154 = vector.broadcast %146 : vector<2x1x128xf32> to vector<2x16x128xf32>
    %155 = arith.subf %142, %154 : vector<2x16x128xf32>
    %cst_50 = arith.constant 9.99999974E-6 : f32
    %156 = vector.broadcast %cst_50 : f32 to vector<2x1x128xf32>
    %157 = arith.addf %153, %156 : vector<2x1x128xf32>
    %158 = math.rsqrt %157 : vector<2x1x128xf32>
    %159 = vector.broadcast %158 : vector<2x1x128xf32> to vector<2x16x128xf32>
    %160 = arith.mulf %155, %159 : vector<2x16x128xf32>
    %161 = vector.shape_cast %160 : vector<2x16x128xf32> to vector<32x128xf32>
    %162 = arith.addf %161, %1 : vector<32x128xf32>
    %c0_51 = arith.constant 0 : index
    %c0_52 = arith.constant 0 : index
    %163 = vector.load %arg5[%c0_51, %c0_52] : memref<384x128xf32, #tpu.memory_space<vmem>>, vector<384x128xf32>
    %c0_53 = arith.constant 0 : index
    %c0_54 = arith.constant 0 : index
    %164 = vector.load %arg6[%c0_53, %c0_54] : memref<1x128xf32, #tpu.memory_space<vmem>>, vector<1x128xf32>
    %cst_55 = arith.constant dense<0.000000e+00> : vector<32x128xf32>
    %165 = tpu.matmul %27, %162, %cst_55 {dimension_numbers = #tpu.dot_dimension_numbers<[1], [0], [0], [1], [0, 0, 1, 1], [], []>} : vector<32x32xf32>, vector<32x128xf32>, vector<32x128xf32> -> vector<32x128xf32>
    %cst_56 = arith.constant dense<0.000000e+00> : vector<32x128xf32>
    %166 = tpu.matmul %51, %162, %cst_56 {dimension_numbers = #tpu.dot_dimension_numbers<[1], [0], [0], [1], [0, 0, 1, 1], [], []>} : vector<32x32xf32>, vector<32x128xf32>, vector<32x128xf32> -> vector<32x128xf32>
    %167 = tpu.concatenate %165, %162, %166 in 1 : vector<32x128xf32>, vector<32x128xf32>, vector<32x128xf32> -> vector<32x384xf32>
    %cst_57 = arith.constant dense<0.000000e+00> : vector<32x128xf32>
    %168 = tpu.matmul %167, %163, %cst_57 {dimension_numbers = #tpu.dot_dimension_numbers<[1], [0], [0], [1], [0, 0, 1, 1], [], []>} : vector<32x384xf32>, vector<384x128xf32>, vector<32x128xf32> -> vector<32x128xf32>
    %169 = vector.broadcast %164 : vector<1x128xf32> to vector<32x128xf32>
    %170 = arith.addf %168, %169 : vector<32x128xf32>
    %cst_58 = arith.constant 0.000000e+00 : f32
    %171 = vector.broadcast %cst_58 : f32 to vector<32x128xf32>
    %172 = arith.maximumf %170, %171 : vector<32x128xf32>
    %173 = vector.shape_cast %172 : vector<32x128xf32> to vector<2x16x128xf32>
    %cst_59 = arith.constant dense<0.000000e+00> : vector<2x128xf32>
    %174 = vector.multi_reduction <add>, %173, %cst_59 [1] : vector<2x16x128xf32> to vector<2x128xf32>
    %175 = vector.shape_cast %174 : vector<2x128xf32> to vector<2x1x128xf32>
    %cst_60 = arith.constant 1.600000e+01 : f32
    %176 = vector.broadcast %cst_60 : f32 to vector<2x1x128xf32>
    %177 = arith.divf %175, %176 : vector<2x1x128xf32>
    %178 = vector.broadcast %177 : vector<2x1x128xf32> to vector<2x16x128xf32>
    %179 = arith.subf %173, %178 : vector<2x16x128xf32>
    %180 = arith.mulf %179, %179 : vector<2x16x128xf32>
    %cst_61 = arith.constant dense<0.000000e+00> : vector<2x128xf32>
    %181 = vector.multi_reduction <add>, %180, %cst_61 [1] : vector<2x16x128xf32> to vector<2x128xf32>
    %182 = vector.shape_cast %181 : vector<2x128xf32> to vector<2x1x128xf32>
    %cst_62 = arith.constant 1.600000e+01 : f32
    %183 = vector.broadcast %cst_62 : f32 to vector<2x1x128xf32>
    %184 = arith.divf %182, %183 : vector<2x1x128xf32>
    %185 = vector.broadcast %177 : vector<2x1x128xf32> to vector<2x16x128xf32>
    %186 = arith.subf %173, %185 : vector<2x16x128xf32>
    %cst_63 = arith.constant 9.99999974E-6 : f32
    %187 = vector.broadcast %cst_63 : f32 to vector<2x1x128xf32>
    %188 = arith.addf %184, %187 : vector<2x1x128xf32>
    %189 = math.rsqrt %188 : vector<2x1x128xf32>
    %190 = vector.broadcast %189 : vector<2x1x128xf32> to vector<2x16x128xf32>
    %191 = arith.mulf %186, %190 : vector<2x16x128xf32>
    %192 = vector.shape_cast %191 : vector<2x16x128xf32> to vector<32x128xf32>
    %c0_64 = arith.constant 0 : index
    %c0_65 = arith.constant 0 : index
    %193 = vector.load %arg7[%c0_64, %c0_65] : memref<512x128xf32, #tpu.memory_space<vmem>>, vector<512x128xf32>
    %c0_66 = arith.constant 0 : index
    %c0_67 = arith.constant 0 : index
    %194 = vector.load %arg8[%c0_66, %c0_67] : memref<1x128xf32, #tpu.memory_space<vmem>>, vector<1x128xf32>
    %cst_68 = arith.constant dense<0.000000e+00> : vector<16x128xf32>
    %195 = tpu.matmul %79, %192, %cst_68 {dimension_numbers = #tpu.dot_dimension_numbers<[1], [0], [0], [1], [0, 0, 1, 1], [], []>} : vector<16x32xf32>, vector<32x128xf32>, vector<16x128xf32> -> vector<16x128xf32>
    %cst_69 = arith.constant dense<0.000000e+00> : vector<16x128xf32>
    %196 = tpu.matmul %84, %192, %cst_69 {dimension_numbers = #tpu.dot_dimension_numbers<[1], [0], [0], [1], [0, 0, 1, 1], [], []>} : vector<16x32xf32>, vector<32x128xf32>, vector<16x128xf32> -> vector<16x128xf32>
    %cst_70 = arith.constant dense<0.000000e+00> : vector<16x128xf32>
    %197 = tpu.matmul %91, %192, %cst_70 {dimension_numbers = #tpu.dot_dimension_numbers<[1], [0], [0], [1], [0, 0, 1, 1], [], []>} : vector<16x32xf32>, vector<32x128xf32>, vector<16x128xf32> -> vector<16x128xf32>
    %cst_71 = arith.constant dense<0.000000e+00> : vector<16x128xf32>
    %198 = tpu.matmul %101, %192, %cst_71 {dimension_numbers = #tpu.dot_dimension_numbers<[1], [0], [0], [1], [0, 0, 1, 1], [], []>} : vector<16x32xf32>, vector<32x128xf32>, vector<16x128xf32> -> vector<16x128xf32>
    %199 = tpu.concatenate %195, %196, %197, %198 in 1 : vector<16x128xf32>, vector<16x128xf32>, vector<16x128xf32>, vector<16x128xf32> -> vector<16x512xf32>
    %cst_72 = arith.constant dense<0.000000e+00> : vector<16x128xf32>
    %200 = tpu.matmul %199, %193, %cst_72 {dimension_numbers = #tpu.dot_dimension_numbers<[1], [0], [0], [1], [0, 0, 1, 1], [], []>} : vector<16x512xf32>, vector<512x128xf32>, vector<16x128xf32> -> vector<16x128xf32>
    %201 = vector.broadcast %194 : vector<1x128xf32> to vector<16x128xf32>
    %202 = arith.addf %200, %201 : vector<16x128xf32>
    %cst_73 = arith.constant 0.000000e+00 : f32
    %203 = vector.broadcast %cst_73 : f32 to vector<16x128xf32>
    %204 = arith.maximumf %202, %203 : vector<16x128xf32>
    %205 = vector.shape_cast %204 : vector<16x128xf32> to vector<2x8x128xf32>
    %cst_74 = arith.constant dense<0.000000e+00> : vector<2x128xf32>
    %206 = vector.multi_reduction <add>, %205, %cst_74 [1] : vector<2x8x128xf32> to vector<2x128xf32>
    %207 = vector.shape_cast %206 : vector<2x128xf32> to vector<2x1x128xf32>
    %cst_75 = arith.constant 8.000000e+00 : f32
    %208 = vector.broadcast %cst_75 : f32 to vector<2x1x128xf32>
    %209 = arith.divf %207, %208 : vector<2x1x128xf32>
    %210 = vector.broadcast %209 : vector<2x1x128xf32> to vector<2x8x128xf32>
    %211 = arith.subf %205, %210 : vector<2x8x128xf32>
    %212 = arith.mulf %211, %211 : vector<2x8x128xf32>
    %cst_76 = arith.constant dense<0.000000e+00> : vector<2x128xf32>
    %213 = vector.multi_reduction <add>, %212, %cst_76 [1] : vector<2x8x128xf32> to vector<2x128xf32>
    %214 = vector.shape_cast %213 : vector<2x128xf32> to vector<2x1x128xf32>
    %cst_77 = arith.constant 8.000000e+00 : f32
    %215 = vector.broadcast %cst_77 : f32 to vector<2x1x128xf32>
    %216 = arith.divf %214, %215 : vector<2x1x128xf32>
    %217 = vector.broadcast %209 : vector<2x1x128xf32> to vector<2x8x128xf32>
    %218 = arith.subf %205, %217 : vector<2x8x128xf32>
    %cst_78 = arith.constant 9.99999974E-6 : f32
    %219 = vector.broadcast %cst_78 : f32 to vector<2x1x128xf32>
    %220 = arith.addf %216, %219 : vector<2x1x128xf32>
    %221 = math.rsqrt %220 : vector<2x1x128xf32>
    %222 = vector.broadcast %221 : vector<2x1x128xf32> to vector<2x8x128xf32>
    %223 = arith.mulf %218, %222 : vector<2x8x128xf32>
    %224 = vector.shape_cast %223 : vector<2x8x128xf32> to vector<16x128xf32>
    %cst_79 = arith.constant dense<0.000000e+00> : vector<16x128xf32>
    %225 = tpu.matmul %84, %1, %cst_79 {dimension_numbers = #tpu.dot_dimension_numbers<[1], [0], [0], [1], [0, 0, 1, 1], [], []>} : vector<16x32xf32>, vector<32x128xf32>, vector<16x128xf32> -> vector<16x128xf32>
    %cst_80 = arith.constant dense<0.000000e+00> : vector<16x128xf32>
    %226 = tpu.matmul %91, %1, %cst_80 {dimension_numbers = #tpu.dot_dimension_numbers<[1], [0], [0], [1], [0, 0, 1, 1], [], []>} : vector<16x32xf32>, vector<32x128xf32>, vector<16x128xf32> -> vector<16x128xf32>
    %227 = arith.addf %225, %226 : vector<16x128xf32>
    %cst_81 = arith.constant 5.000000e-01 : f32
    %228 = vector.broadcast %cst_81 : f32 to vector<16x128xf32>
    %229 = arith.mulf %228, %227 : vector<16x128xf32>
    %230 = arith.addf %224, %229 : vector<16x128xf32>
    %231 = vector.shape_cast %230 : vector<16x128xf32> to vector<2x8x128xf32>
    %c0_82 = arith.constant 0 : index
    %c0_83 = arith.constant 0 : index
    %c0_84 = arith.constant 0 : index
    %232 = vector.load %arg9[%c0_82, %c0_83, %c0_84] : memref<2x8x128xf32, #tpu.memory_space<vmem>>, vector<2x8x128xf32>
    tpu.vector_store %arg9[%c0_82, %c0_83, %c0_84], %231 {strides = array<i32>} : memref<2x8x128xf32, #tpu.memory_space<vmem>>, vector<2x8x128xf32>,
    return
  }
}

</mosaic_0001>

<bundles_post_ra>
// kernel: content_encoder_block_forward.1
= control target key start
LH: loop header
LB: loop body
LE: loop exit
PB: predicated region body
PF: predicated region fallthrough
CT: control target
= control target key end

     0   :  { %14 = vsyncpa [#allocation3], 0  ;;  %s3585_s0 = inlined_call_operand.hbm [shape: f32[2,16,128], index: 0, kind: input, shape index: {}]   ;;  %s3586_s1 = inlined_call_operand.hbm [shape: f32[384,128], index: 1, kind: input, shape index: {}]   ;;  %s3587_s2 = inlined_call_operand.vmem [shape: f32[1,128], index: 2, kind: input, shape index: {}]   ;;  %s3588_s3 = inlined_call_operand.hbm [shape: f32[384,128], index: 3, kind: input, shape index: {}]   ;;  %s3589_s4 = inlined_call_operand.vmem [shape: f32[1,128], index: 4, kind: input, shape index: {}]   ;;  %s3590_s5 = inlined_call_operand.hbm [shape: f32[384,128], index: 5, kind: input, shape index: {}]   ;;  %s3591_s6 = inlined_call_operand.vmem [shape: f32[1,128], index: 6, kind: input, shape index: {}]   ;;  %s3592_s7 = inlined_call_operand.hbm [shape: f32[512,128], index: 7, kind: input, shape index: {}]   ;;  %s3593_s8 = inlined_call_operand.vmem [shape: f32[1,128], index: 8, kind: input, shape index: {}]   ;;  %s3594_s9 = inlined_call_operand.hbm [shape: f32[2,8,128], index: 9, kind: output, shape index: {}]  }
   0x1   :  { %15 = vsyncpa [#allocation6], 0 }
   0x2   :  { %16 = vsyncpa [#allocation9], 0 }
   0x3   :  { %17 = vsyncpa [#allocation4], 0  ;;  %s3239_s30 = smov [#allocation5]   ;;  %s3240_s11 = smov [#allocation8]  }
   0x4   :  { %s35_s10 = sshll.u32 %s3239_s30, 4  ;;  %s63_s12 = sshll.u32 %s3240_s11, 4  ;;  %s36_s10 = int_to_ptr.vmem [resolvable:$true] %s35_s10  ;;  %s64_s12 = int_to_ptr.vmem [resolvable:$true] %s63_s12 }
   0x5   :  { %s3119_s13 = scalar_lea.vmem %s36_s10, 6144  ;;  %p3124_p1 = scmp.lt.s32.totalorder %s36_s10, %s36_s10 }
   0x6   :  { %p3120_p0 = scmp.ne.s32.totalorder %s36_s10, %s3119_s13  ;;  %p3125_p2 = scmp.lt.s32.totalorder %s3119_s13, %s3119_s13 }
   0x8   :  { %p3126_p3 = por %p3125_p2, %p3124_p1 }
   0xa   :  { %p3127_p4 = pnand %p3126_p3, %p3120_p0 }
   0xc   :  { %3130 = shalt.err (!%p3127_p4)
}
   0xd   :  { %s3241_s14 = smov 128   ;;  %s3242_s15 = smov 8  }
   0xe   :  { %41 = dma.hbm_to_vmem [thread:$0]  %s3586_s1, 6144, %s36_s10, [#allocation6], %s3241_s14, %s3241_s14, %s3242_s15  }
   0xf   :  { %s3139_s18 = scalar_lea.vmem %s64_s12, 6144  ;;  %p3144_p6 = scmp.lt.s32.totalorder %s64_s12, %s64_s12 }
  0x10   :  { %p3140_p5 = scmp.ne.s32.totalorder %s64_s12, %s3139_s18  ;;  %p3145_p7 = scmp.lt.s32.totalorder %s3139_s18, %s3139_s18 }
  0x12   :  { %p3146_p8 = por %p3145_p7, %p3144_p6 }
  0x14   :  { %p3147_p9 = pnand %p3146_p8, %p3140_p5 }
  0x16   :  { %3150 = shalt.err (!%p3147_p9)
}
  0x17   :  { %69 = dma.hbm_to_vmem [thread:$0]  %s3590_s5, 6144, %s64_s12, [#allocation9], %s3241_s14, %s3241_s14, %s3242_s15  }
  0x18   :  { %s3243_s21 = smov [#allocation2]   ;;  %s3244_s23 = smov [#allocation7]  }
  0x19   :  { %s23_s22 = sshll.u32 %s3243_s21, 4  ;;  %s49_s24 = sshll.u32 %s3244_s23, 4  ;;  %s24_s22 = int_to_ptr.vmem [resolvable:$true] %s23_s22  ;;  %s50_s24 = int_to_ptr.vmem [resolvable:$true] %s49_s24 }
  0x1a   :  { %s3159_s1 = scalar_lea.vmem %s24_s22, 512  ;;  %p3164_p11 = scmp.lt.s32.totalorder %s24_s22, %s24_s22 }
  0x1b   :  { %p3160_p10 = scmp.ne.s32.totalorder %s24_s22, %s3159_s1  ;;  %p3165_p12 = scmp.lt.s32.totalorder %s3159_s1, %s3159_s1 }
  0x1d   :  { %p3166_p13 = por %p3165_p12, %p3164_p11 }
  0x1f   :  { %p3167_p0 = pnand %p3166_p13, %p3160_p10 }
  0x21   :  { %3170 = shalt.err (!%p3167_p0)
}
  0x22   :  { %29 = dma.hbm_to_vmem [thread:$0]  %s3585_s0, 512, %s24_s22, [#allocation3], %s3241_s14, %s3241_s14, %s3242_s15  }
  0x23   :  { %s3179_s5 = scalar_lea.vmem %s50_s24, 6144  ;;  %p3184_p2 = scmp.lt.s32.totalorder %s50_s24, %s50_s24 }
  0x24   :  { %p3180_p1 = scmp.ne.s32.totalorder %s50_s24, %s3179_s5  ;;  %p3185_p3 = scmp.lt.s32.totalorder %s3179_s5, %s3179_s5 }
  0x26   :  { %p3186_p4 = por %p3185_p3, %p3184_p2 }
  0x28   :  { %p3187_p5 = pnand %p3186_p4, %p3180_p1 }
  0x2a   :  { %3190 = shalt.err (!%p3187_p5)
}
  0x2b   :  { %55 = dma.hbm_to_vmem [thread:$0]  %s3588_s3, 6144, %s50_s24, [#allocation6], %s3241_s14, %s3241_s14, %s3242_s15  }
  0x2c   :  { %s3245_s29 = smov [#allocation10]  }
  0x2d   :  { %s77_s30 = sshll.u32 %s3245_s29, 4  ;;  %s78_s30 = int_to_ptr.vmem [resolvable:$true] %s77_s30 }
  0x2e   :  { %s3199_s10 = scalar_lea.vmem %s78_s30, 8192  ;;  %p3204_p7 = scmp.lt.s32.totalorder %s78_s30, %s78_s30 }
  0x2f   :  { %p3200_p6 = scmp.ne.s32.totalorder %s78_s30, %s3199_s10  ;;  %p3205_p8 = scmp.lt.s32.totalorder %s3199_s10, %s3199_s10 }
  0x31   :  { %p3206_p9 = por %p3205_p8, %p3204_p7 }
  0x33   :  { %p3207_p10 = pnand %p3206_p9, %p3200_p6 }
  0x35   :  { %3210 = shalt.err (!%p3207_p10)
}
  0x36   :  { %83 = dma.hbm_to_vmem [thread:$0]  %s3592_s7, 8192, %s78_s30, [#allocation9], %s3241_s14, %s3241_s14, %s3242_s15  }
  0x37   :  { %3231 = dma.done.wait [#allocation3], 512  }
  0x38   :  { %3232 = vsyncadd [#allocation3], 4294966784 }
  0x39   :  { %3233 = dma.done.wait [#allocation6], 12288  }
  0x3a   :  { %3234 = vsyncadd [#allocation6], 4294955008 }
  0x3b   :  { %3235 = dma.done.wait [#allocation9], 14336  }
  0x3c   :  { %3236 = vsyncadd [#allocation9], 4294952960  ;;  %v105_v0 = vlaneseq  ;;  %v3341_v9 = vld [vmem:[#allocation2 + $0x18] sm:$0xff]  ;;  %v3343_v10 = vld [vmem:[#allocation2 + $0x10] sm:$0xff]  ;;  %vm321_vm3 = vcmask 261120   ;;  %v3246_v17 = vmov 0.0  }
  0x3d   :  { %2818 = vmatprep.subr.mxu0 %v3341_v9  ;;  %2832 = vmatprep.subr.mxu1 %v3341_v9  ;;  %v3351_v16 = vld [vmem:[#allocation2 + $0x8] sm:$0xff]  ;;  %v3367_v22 = vld [vmem:[#allocation2] sm:$0xff]  ;;  %v303_v29 = vld [vmem:[#allocation5 + $0xf8] sm:$0xff] }
  0x3e   :  { %v3328_v1 = vshrl.u32 %v105_v0, 7  ;;  %v3330_v2 = vand.u32 127, %v105_v0  ;;  %2819 = vmatpush3.msra.mxu0 %v3341_v9  ;;  %2833 = vmatpush3.msra.mxu1 %v3341_v9  ;;  %v287_v31 = vld [vmem:[#allocation5 + $0x78] sm:$0xff]  ;;  %v302_v33 = vld [vmem:[#allocation5 + $0xf0] sm:$0xff]  ;;  %v301_v37 = vld [vmem:[#allocation5 + $0xe8] sm:$0xff] }
  0x3f   :  { %2820 = vmatprep.subr.mxu0 %v3343_v10  ;;  %2834 = vmatprep.subr.mxu1 %v3343_v10  ;;  %v286_v34 = vld [vmem:[#allocation5 + $0x70] sm:$0xff]  ;;  %v319_v35 = vld [vmem:[#allocation5 + $0x178] sm:$0xff]  ;;  %v285_v38 = vld [vmem:[#allocation5 + $0x68] sm:$0xff] }
  0x40   :  { %v2404_v3 = vadd.s32 4294967295, %v3328_v1  ;;  %v124_v4 = vand.u32 15, %v3328_v1  ;;  %v3335_v5 = vadd.s32 8, %v3328_v1  ;;  %v108_v6 = vadd.s32 16, %v3328_v1  ;;  %2821 = vmatpush3.msra.mxu0 %v3343_v10  ;;  %2835 = vmatpush3.msra.mxu1 %v3343_v10  ;;  %v300_v39 = vld [vmem:[#allocation5 + $0xe0] sm:$0xff]  ;;  %v318_v40 = vld [vmem:[#allocation5 + $0x170] sm:$0xff] }
  0x41   :  { %v109_v8 = vadd.s32 24, %v3328_v1  ;;  %v184_v11 = vadd.s32 1, %v3328_v1  ;;  %2822 = vmatprep.subr.mxu0 %v3351_v16  ;;  %2836 = vmatprep.subr.mxu1 %v3351_v16  ;;  %v284_v41 = vld [vmem:[#allocation5 + $0x60] sm:$0xff]  ;;  %v299_v42 = vld [vmem:[#allocation5 + $0xd8] sm:$0xff]  ;;  %v317_v43 = vld [vmem:[#allocation5 + $0x168] sm:$0xff] }
  0x42   :  { %vm116_vm0 = vcmp.eq.s32.totalorder %v3330_v2, %v2404_v3  ;;  %vm168_vm1 = vcmp.ne.s32.totalorder %v124_v4, 0  ;;  %v2405_v7 = vadd.s32 4294967295, %v3335_v5  ;;  %v131_v12 = vand.u32 15, %v3335_v5  ;;  %2823 = vmatpush3.msra.mxu0 %v3351_v16  ;;  %2837 = vmatpush3.msra.mxu1 %v3351_v16  ;;  %v283_v44 = vld [vmem:[#allocation5 + $0x58] sm:$0xff]  ;;  %v298_v45 = vld [vmem:[#allocation5 + $0xd0] sm:$0xff]  ;;  %v316_v46 = vld [vmem:[#allocation5 + $0x160] sm:$0xff] }
  0x43   :  { %v185_v13 = vadd.s32 1, %v3335_v5  ;;  %vm172_vm2 = vmand %vm116_vm0, %vm168_vm1  ;;  %v2406_v14 = vadd.s32 4294967295, %v108_v6  ;;  %v138_v15 = vand.u32 15, %v108_v6  ;;  %v2407_v20 = vadd.s32 4294967295, %v109_v8  ;;  %2824 = vmatprep.subr.mxu0 %v3367_v22  ;;  %2838 = vmatprep.subr.mxu1 %v3367_v22  ;;  %v282_v47 = vld [vmem:[#allocation5 + $0x50] sm:$0xff]  ;;  %v297_v48 = vld [vmem:[#allocation5 + $0xc8] sm:$0xff] }
  0x44   :  { %v3355_v18 = vsel %vm172_vm2, 1.0, %v3246_v17  ;;  %vm117_vm4 = vcmp.eq.s32.totalorder %v3330_v2, %v2405_v7  ;;  %vm3359_vm6 = vcmp.ne.s32.totalorder %v131_v12, 15  ;;  %v186_v21 = vadd.s32 1, %v108_v6  ;;  %2825 = vmatpush3.msra.mxu0 %v3367_v22  ;;  %2839 = vmatpush3.msra.mxu1 %v3367_v22  ;;  %v315_v49 = vld [vmem:[#allocation5 + $0x158] sm:$0xff]  ;;  %v281_v50 = vld [vmem:[#allocation5 + $0x48] sm:$0xff]  ;;  %v296_v51 = vld [vmem:[#allocation5 + $0xc0] sm:$0xff] }
  0x45   :  { %vm189_vm5 = vcmp.eq.s32.totalorder %v3330_v2, %v185_v13  ;;  %vm118_vm7 = vcmp.eq.s32.totalorder %v3330_v2, %v2406_v14  ;;  %vm170_vm8 = vcmp.ne.s32.totalorder %v138_v15, 0  ;;  %vm188_vm9 = vcmp.eq.s32.totalorder %v3330_v2, %v184_v11  ;;  %2826 = vmatprep.mubr.msk.f32.mxu0 %vm321_vm3, %v3355_v18  ;;  %2482 = vmatprep.subr.mxu0 %v303_v29  ;;  %v314_v52 = vld [vmem:[#allocation5 + $0x150] sm:$0xff]  ;;  %v280_v53 = vld [vmem:[#allocation5 + $0x40] sm:$0xff]  ;;  %v295_v54 = vld [vmem:[#allocation5 + $0xb8] sm:$0xff] }
  0x46   :  { %vm174_vm10 = vmand %vm118_vm7, %vm170_vm8  ;;  %v145_v23 = vand.u32 15, %v109_v8  ;;  %v187_v24 = vadd.s32 1, %v109_v8  ;;  %v3383_v25 = vsel %vm117_vm4, 1.0, %v3246_v17  ;;  %vm190_vm12 = vcmp.eq.s32.totalorder %v3330_v2, %v186_v21  ;;  %2846 = vmatprep.subr.mxu1 %v319_v35  ;;  %v313_v55 = vld [vmem:[#allocation5 + $0x148] sm:$0xff]  ;;  %v279_v56 = vld [vmem:[#allocation5 + $0x38] sm:$0xff] }
  0x47   :  { %vm197_vm11 = vmand %vm189_vm5, %vm3359_vm6  ;;  %v3390_v26 = vsel %vm188_vm9, 1.0, %v3246_v17  ;;  %v3393_v27 = vsel %vm174_vm10, 1.0, %v3246_v17  ;;  %vm119_vm15 = vcmp.eq.s32.totalorder %v3330_v2, %v2407_v20  ;;  %2827 = vmatmul.mubr.msk.f32.vlgmr.msra.gmra.mxu0 %vm321_vm3, %v3383_v25  ;;  %v3405_v30 = vsel %vm190_vm12, 1.0, %v3246_v17  ;;  %v294_v57 = vld [vmem:[#allocation5 + $0xb0] sm:$0xff]  ;;  %v312_v58 = vld [vmem:[#allocation5 + $0x140] sm:$0xff] }
  0x48   :  { %vm191_vm13 = vcmp.eq.s32.totalorder %v3330_v2, %v187_v24  ;;  %vm195_vm14 = vcmp.ne.s32.totalorder %v145_v23, 15  ;;  %v3399_v28 = vsel %vm197_vm11, 1.0, %v3246_v17  ;;  %2840 = vmatprep.mubr.msk.f32.mxu1 %vm321_vm3, %v3390_v26  ;;  %2829 = vmatprep.mubr.msk.f32.mxu0 %vm321_vm3, %v3393_v27  ;;  %v3412_v32 = vsel %vm119_vm15, 1.0, %v3246_v17  ;;  %v278_v59 = vld [vmem:[#allocation5 + $0x30] sm:$0xff]  ;;  %v293_v60 = vld [vmem:[#allocation5 + $0xa8] sm:$0xff]  ;;  %v311_v61 = vld [vmem:[#allocation5 + $0x138] sm:$0xff] }
  0x49   :  { %vm199_vm0 = vmand %vm191_vm13, %vm195_vm14  ;;  %2841 = vmatmul.mubr.msk.f32.vlgmr.msra.gmra.mxu1 %vm321_vm3, %v3399_v28  ;;  %2483 = vmatpush3.msra.mxu0 %v287_v31  ;;  %v277_v62 = vld [vmem:[#allocation5 + $0x28] sm:$0xff]  ;;  %v292_v63 = vld [vmem:[#allocation5 + $0xa0] sm:$0xff] }
  0x4a   :  { %2843 = vmatprep.mubr.msk.f32.mxu1 %vm321_vm3, %v3405_v30  ;;  %v3419_v36 = vsel %vm199_vm0, 1.0, %v3246_v17  ;;  %2484 = vmatprep.subr.mxu0 %v302_v33  ;;  %v310_v0 = vld [vmem:[#allocation5 + $0x130] sm:$0xff]  ;;  %v276_v3 = vld [vmem:[#allocation5 + $0x20] sm:$0xff]  ;;  %v291_v4 = vld [vmem:[#allocation5 + $0x98] sm:$0xff] }
  0x4b   :  { %2830 = vmatmul.mubr.msk.f32.gmra.mxu0 %vm321_vm3, %v3412_v32  ;;  %2847 = vmatpush3.msra.mxu1 %v319_v35  ;;  %v309_v6 = vld [vmem:[#allocation5 + $0x128] sm:$0xff]  ;;  %v275_v7 = vld [vmem:[#allocation5 + $0x18] sm:$0xff]  ;;  %v290_v8 = vld [vmem:[#allocation5 + $0x90] sm:$0xff] }
  0x4c   :  { %2485 = vmatpush3.msra.mxu0 %v286_v34  ;;  %2848 = vmatprep.subr.mxu1 %v318_v40  ;;  %v308_v11 = vld [vmem:[#allocation5 + $0x120] sm:$0xff]  ;;  %v274_v12 = vld [vmem:[#allocation5 + $0x10] sm:$0xff]  ;;  %v289_v13 = vld [vmem:[#allocation5 + $0x88] sm:$0xff] }
  0x4d   :  { %2844 = vmatmul.mubr.msk.f32.gmra.mxu1 %vm321_vm3, %v3419_v36  ;;  %2486 = vmatprep.subr.mxu0 %v301_v37  ;;  %v307_v14 = vld [vmem:[#allocation5 + $0x118] sm:$0xff]  ;;  %v273_v15 = vld [vmem:[#allocation5 + $0x8] sm:$0xff]  ;;  %v288_v19 = vld [vmem:[#allocation5 + $0x80] sm:$0xff] }
  0x4e   :  { %2487 = vmatpush3.msra.mxu0 %v285_v38  ;;  %2849 = vmatpush3.msra.mxu1 %v318_v40  ;;  %v306_v20 = vld [vmem:[#allocation5 + $0x110] sm:$0xff]  ;;  %v272_v21 = vld [vmem:[#allocation5] sm:$0xff]  ;;  %v305_v23 = vld [vmem:[#allocation5 + $0x108] sm:$0xff] }
  0x4f   :  { %2488 = vmatprep.subr.mxu0 %v300_v39  ;;  %2850 = vmatprep.subr.mxu1 %v317_v43  ;;  %v304_v24 = vld [vmem:[#allocation5 + $0x100] sm:$0xff] }
  0x50   :  { %2489 = vmatpush3.msra.mxu0 %v284_v41  ;;  %2851 = vmatpush3.msra.mxu1 %v317_v43 }
  0x51   :  { %2490 = vmatprep.subr.mxu0 %v299_v42  ;;  %2852 = vmatprep.subr.mxu1 %v316_v46  ;;  %v2434_v42 = vld [vmem:[%s3587_s2] ss:$0 sm:$0xff] }
  0x52   :  { %2491 = vmatpush3.msra.mxu0 %v283_v44  ;;  %2853 = vmatpush3.msra.mxu1 %v316_v46 }
  0x53   :  { %2492 = vmatprep.subr.mxu0 %v298_v45  ;;  %2854 = vmatprep.subr.mxu1 %v315_v49 }
  0x54   :  { %2493 = vmatpush3.msra.mxu0 %v282_v47  ;;  %2855 = vmatpush3.msra.mxu1 %v315_v49 }
  0x55   :  { %2494 = vmatprep.subr.mxu0 %v297_v48  ;;  %2856 = vmatprep.subr.mxu1 %v314_v52 }
  0x56   :  { %2495 = vmatpush3.msra.mxu0 %v281_v50  ;;  %2857 = vmatpush3.msra.mxu1 %v314_v52 }
  0x57   :  { %2496 = vmatprep.subr.mxu0 %v296_v51  ;;  %2858 = vmatprep.subr.mxu1 %v313_v55 }
  0x58   :  { %2497 = vmatpush3.msra.mxu0 %v280_v53  ;;  %2859 = vmatpush3.msra.mxu1 %v313_v55 }
  0x59   :  { %2498 = vmatprep.subr.mxu0 %v295_v54  ;;  %2860 = vmatprep.subr.mxu1 %v312_v58 }
  0x5a   :  { %2499 = vmatpush3.msra.mxu0 %v279_v56  ;;  %2861 = vmatpush3.msra.mxu1 %v312_v58 }
  0x5b   :  { %2500 = vmatprep.subr.mxu0 %v294_v57  ;;  %2862 = vmatprep.subr.mxu1 %v311_v61 }
  0x5c   :  { %2501 = vmatpush3.msra.mxu0 %v278_v59  ;;  %2863 = vmatpush3.msra.mxu1 %v311_v61 }
  0x5d   :  { %2502 = vmatprep.subr.mxu0 %v293_v60  ;;  %2864 = vmatprep.subr.mxu1 %v310_v0 }
  0x5e   :  { %2503 = vmatpush3.msra.mxu0 %v277_v62  ;;  %2865 = vmatpush3.msra.mxu1 %v310_v0 }
  0x5f   :  { %2504 = vmatprep.subr.mxu0 %v292_v63  ;;  %2866 = vmatprep.subr.mxu1 %v309_v6 }
  0x60   :  { %2505 = vmatpush3.msra.mxu0 %v276_v3  ;;  %2867 = vmatpush3.msra.mxu1 %v309_v6 }
  0x61   :  { %2506 = vmatprep.subr.mxu0 %v291_v4  ;;  %2868 = vmatprep.subr.mxu1 %v308_v11 }
  0x62   :  { %2507 = vmatpush3.msra.mxu0 %v275_v7  ;;  %2869 = vmatpush3.msra.mxu1 %v308_v11 }
  0x63   :  { %2508 = vmatprep.subr.mxu0 %v290_v8  ;;  %2870 = vmatprep.subr.mxu1 %v307_v14 }
  0x64   :  { %2509 = vmatpush3.msra.mxu0 %v274_v12  ;;  %2871 = vmatpush3.msra.mxu1 %v307_v14 }
  0x65   :  { %2510 = vmatprep.subr.mxu0 %v289_v13  ;;  %586 = vmatprep.mubr.f32.mxu0 %v3367_v22 }
  0x66   :  { %2511 = vmatpush3.msra.mxu0 %v273_v15  ;;  %2872 = vmatprep.subr.mxu1 %v306_v20 }
  0x67   :  { %2512 = vmatprep.subr.mxu0 %v288_v19  ;;  %2873 = vmatpush3.msra.mxu1 %v306_v20 }
  0x68   :  { %2513 = vmatpush3.msra.mxu0 %v272_v21  ;;  %2874 = vmatprep.subr.mxu1 %v305_v23 }
  0x69   :  { %2875 = vmatpush3.msra.mxu1 %v305_v23 }
  0x6a   :  { %2876 = vmatprep.subr.mxu1 %v304_v24 }
  0x6b   :  { %2877 = vmatpush3.msra.mxu1 %v304_v24 }
 0x107   :  { %v2828_v29 = vpop.f32.mrf.mxu0 }
 0x109   :  { %v400_v31 = vpop.f32.mrf.mxu0  ;;  %v2842_v33 = vpop.f32.mrf.mxu1 }
 0x10a   :  { %587 = vmatmul.mubr.f32.vlgmr.msra.gmra.mxu0 %v400_v31 }
 0x10b   :  { %v497_v34 = vpop.f32.mrf.mxu1  ;;  %591 = vmatprep.mubr.f32.mxu0 %v3351_v16  ;;  %v2831_v35 = vpop.f32.mrf.mxu0 }
 0x10c   :  { %2878 = vmatprep.mubr.f32.mxu1 %v497_v34 }
 0x10d   :  { %2879 = vmatmul.mubr.f32.vlgmr.msra.gmra.mxu1 %v2842_v33  ;;  %v2845_v37 = vpop.f32.mrf.mxu1  ;;  %v410_v39 = vpop.f32.mrf.mxu0 }
 0x10e   :  { %592 = vmatmul.mubr.f32.gmra.mxu0 %v2828_v29 }
 0x10f   :  { %596 = vmatprep.mubr.f32.mxu0 %v3343_v10  ;;  %v507_v38 = vpop.f32.mrf.mxu1 }
 0x110   :  { %2881 = vmatprep.mubr.f32.mxu1 %v507_v38 }
 0x111   :  { %2882 = vmatmul.mubr.f32.gmra.mxu1 %v2845_v37 }
 0x112   :  { %597 = vmatmul.mubr.f32.gmra.mxu0 %v410_v39  ;;  %2892 = vmatprep.mubr.msk.f32.mxu1 %vm321_vm3, %v3355_v18 }
 0x113   :  { %601 = vmatprep.mubr.f32.mxu0 %v3341_v9 }
 0x116   :  { %602 = vmatmul.mubr.f32.gmra.mxu0 %v2831_v35 }
 0x117   :  { %2906 = vmatprep.mubr.msk.f32.mxu0 %vm321_vm3, %v3390_v26 }
 0x1ca   :  { %v2514_v40 = vpop.f32.mrf.mxu0 }
 0x1cc   :  { %v2515_v41 = vpop.f32.mrf.mxu0 }
 0x1cd   :  { %v2516_v43 = vadd.f32 %v2515_v41, %v2514_v40  ;;  %v2880_v44 = vpop.f32.mrf.mxu1 }
 0x1ce   :  { %v2517_v45 = vpop.f32.mrf.mxu0 }
 0x1cf   :  { %v589_v46 = vadd.f32 %v2516_v43, %v2434_v42  ;;  %v673_v48 = vpop.f32.mrf.mxu1 }
 0x1d0   :  { %v2518_v47 = vpop.f32.mrf.mxu0 }
 0x1d1   :  { %v2519_v49 = vadd.f32 %v2518_v47, %v2517_v45  ;;  %v674_v52 = vadd.f32 %v673_v48, %v589_v46  ;;  %v2883_v54 = vpop.f32.mrf.mxu1 }
 0x1d2   :  { %v2520_v50 = vpop.f32.mrf.mxu0 }
 0x1d3   :  { %v594_v51 = vadd.f32 %v2519_v49, %v2434_v42  ;;  %v692_v58 = vmax.f32 %v674_v52, 0.0  ;;  %v683_v61 = vpop.f32.mrf.mxu1 }
 0x1d4   :  { %v2521_v53 = vpop.f32.mrf.mxu0 }
 0x1d5   :  { %v679_v55 = vadd.f32 %v2880_v44, %v594_v51  ;;  %v2522_v56 = vadd.f32 %v2521_v53, %v2520_v50 }
 0x1d6   :  { %v2523_v57 = vpop.f32.mrf.mxu0 }
 0x1d7   :  { %v693_v59 = vmax.f32 %v679_v55, 0.0  ;;  %v599_v60 = vadd.f32 %v2522_v56, %v2434_v42 }
 0x1d8   :  { %v2524_v62 = vpop.f32.mrf.mxu0 }
 0x1d9   :  { %v696_v63 = vadd.f32 %v693_v59, %v692_v58  ;;  %v2525_v0 = vadd.f32 %v2524_v62, %v2523_v57  ;;  %v684_v4 = vadd.f32 %v683_v61, %v599_v60 }
 0x1db   :  { %v697_v3 = vrot.slane %v696_v63, 4  ;;  %v604_v6 = vadd.f32 %v2525_v0, %v2434_v42  ;;  %v694_v12 = vmax.f32 %v684_v4, 0.0 }
 0x1dd   :  { %v698_v7 = vadd.f32 %v697_v3, %v696_v63  ;;  %v689_v8 = vadd.f32 %v2883_v54, %v604_v6 }
 0x1df   :  { %v699_v11 = vrot.slane %v698_v7, 2  ;;  %v695_v13 = vmax.f32 %v689_v8, 0.0  ;;  %v776_v8 = vld [vmem:[#allocation7 + $0xf8] sm:$0xff] }
 0x1e1   :  { %v700_v14 = vadd.f32 %v699_v11, %v698_v7  ;;  %v703_v15 = vadd.f32 %v695_v13, %v694_v12  ;;  %v792_v11 = vld [vmem:[#allocation7 + $0x178] sm:$0xff] }
 0x1e3   :  { %v701_v19 = vrot.slane %v700_v14, 1  ;;  %v704_v20 = vrot.slane %v703_v15, 4 }
 0x1e5   :  { %v702_v21 = vadd.f32 %v701_v19, %v700_v14  ;;  %v705_v23 = vadd.f32 %v704_v20, %v703_v15  ;;  %v759_v14 = vld [vmem:[#allocation7 + $0x70] sm:$0xff]  ;;  %v774_v19 = vld [vmem:[#allocation7 + $0xe8] sm:$0xff] }
 0x1e6   :  { %v791_v15 = vld [vmem:[#allocation7 + $0x170] sm:$0xff]  ;;  %v758_v20 = vld [vmem:[#allocation7 + $0x68] sm:$0xff] }
 0x1e7   :  { %v711_v24 = vmul.f32 0.0625, %v702_v21  ;;  %v706_v29 = vrot.slane %v705_v23, 2  ;;  %v790_v21 = vld [vmem:[#allocation7 + $0x168] sm:$0xff] }
 0x1e9   :  { %v713_v31 = vsub.f32 %v692_v58, %v711_v24  ;;  %v714_v33 = vsub.f32 %v693_v59, %v711_v24  ;;  %v707_v34 = vadd.f32 %v706_v29, %v705_v23  ;;  %v773_v23 = vld [vmem:[#allocation7 + $0xe0] sm:$0xff] }
 0x1ea   :  { %v757_v24 = vld [vmem:[#allocation7 + $0x60] sm:$0xff] }
 0x1eb   :  { %v717_v35 = vmul.f32 %v713_v31, %v713_v31  ;;  %v718_v37 = vmul.f32 %v714_v33, %v714_v33  ;;  %v708_v38 = vrot.slane %v707_v34, 1  ;;  %v789_v29 = vld [vmem:[#allocation7 + $0x160] sm:$0xff] }
 0x1ed   :  { %v721_v39 = vadd.f32 %v718_v37, %v717_v35  ;;  %v709_v40 = vadd.f32 %v708_v38, %v707_v34  ;;  %v788_v34 = vld [vmem:[#allocation7 + $0x158] sm:$0xff]  ;;  %v771_v35 = vld [vmem:[#allocation7 + $0xd0] sm:$0xff] }
 0x1ee   :  { %v755_v37 = vld [vmem:[#allocation7 + $0x50] sm:$0xff] }
 0x1ef   :  { %v722_v41 = vrot.slane %v721_v39, 4  ;;  %v712_v42 = vmul.f32 0.0625, %v709_v40  ;;  %v787_v38 = vld [vmem:[#allocation7 + $0x150] sm:$0xff]  ;;  %v754_v40 = vld [vmem:[#allocation7 + $0x48] sm:$0xff] }
 0x1f1   :  { %v723_v43 = vadd.f32 %v722_v41, %v721_v39  ;;  %v715_v44 = vsub.f32 %v694_v12, %v712_v42  ;;  %v716_v45 = vsub.f32 %v695_v13, %v712_v42  ;;  %v760_v12 = vld [vmem:[#allocation7 + $0x78] sm:$0xff]  ;;  %v775_v13 = vld [vmem:[#allocation7 + $0xf0] sm:$0xff]  ;;  %v770_v39 = vld [vmem:[#allocation7 + $0xc8] sm:$0xff] }
 0x1f2   :  { %v786_v41 = vld [vmem:[#allocation7 + $0x148] sm:$0xff]  ;;  %v769_v42 = vld [vmem:[#allocation7 + $0xc0] sm:$0xff] }
 0x1f3   :  { %v724_v46 = vrot.slane %v723_v43, 2  ;;  %v719_v47 = vmul.f32 %v715_v44, %v715_v44  ;;  %v720_v48 = vmul.f32 %v716_v45, %v716_v45 }
 0x1f5   :  { %v725_v49 = vadd.f32 %v724_v46, %v723_v43  ;;  %v728_v50 = vadd.f32 %v720_v48, %v719_v47  ;;  %v753_v43 = vld [vmem:[#allocation7 + $0x40] sm:$0xff]  ;;  %v752_v46 = vld [vmem:[#allocation7 + $0x38] sm:$0xff]  ;;  %v767_v48 = vld [vmem:[#allocation7 + $0xb0] sm:$0xff] }
 0x1f6   :  { %v784_v47 = vld [vmem:[#allocation7 + $0x138] sm:$0xff] }
 0x1f7   :  { %v729_v51 = vrot.slane %v728_v50, 4  ;;  %v726_v52 = vrot.slane %v725_v49, 1 }
 0x1f9   :  { %v730_v53 = vadd.f32 %v729_v51, %v728_v50  ;;  %v727_v55 = vadd.f32 %v726_v52, %v725_v49  ;;  %v751_v49 = vld [vmem:[#allocation7 + $0x30] sm:$0xff]  ;;  %v766_v51 = vld [vmem:[#allocation7 + $0xa8] sm:$0xff] }
 0x1fa   :  { %v783_v50 = vld [vmem:[#allocation7 + $0x130] sm:$0xff]  ;;  %v750_v52 = vld [vmem:[#allocation7 + $0x28] sm:$0xff] }
 0x1fb   :  { %v731_v54 = vrot.slane %v730_v53, 2  ;;  %v735_v58 = vmul.f32 0.0625, %v727_v55  ;;  %v749_v55 = vld [vmem:[#allocation7 + $0x20] sm:$0xff] }
 0x1fd   :  { %v732_v56 = vadd.f32 %v731_v54, %v730_v53  ;;  %v737_v61 = vadd.f32 1e-05, %v735_v58  ;;  %v782_v53 = vld [vmem:[#allocation7 + $0x128] sm:$0xff]  ;;  %v765_v54 = vld [vmem:[#allocation7 + $0xa0] sm:$0xff]  ;;  %v748_v58 = vld [vmem:[#allocation7 + $0x18] sm:$0xff] }
 0x1ff   :  { %v733_v57 = vrot.slane %v732_v56, 1 }
 0x201   :  { %v734_v59 = vadd.f32 %v733_v57, %v732_v56  ;;  %v781_v56 = vld [vmem:[#allocation7 + $0x120] sm:$0xff]  ;;  %v764_v57 = vld [vmem:[#allocation7 + $0x98] sm:$0xff] }
 0x203   :  { %v736_v60 = vmul.f32 0.0625, %v734_v59  ;;  %v780_v59 = vld [vmem:[#allocation7 + $0x118] sm:$0xff] }
 0x205   :  { %v738_v62 = vadd.f32 1e-05, %v736_v60  ;;  %v763_v60 = vld [vmem:[#allocation7 + $0x90] sm:$0xff] }
 0x207   :  { %3091 = vrsqrt.f32 %v738_v62  ;;  %v762_v62 = vld [vmem:[#allocation7 + $0x88] sm:$0xff] }
 0x208   :  { %3093 = vrsqrt.f32 %v737_v61  ;;  %v747_v61 = vld [vmem:[#allocation7 + $0x10] sm:$0xff] }
 0x214   :  { %v3092_v63 = vpop.eup %3091 }
 0x215   :  { %v3436_v0 = vmul.f32 %v3092_v63, %v716_v45  ;;  %v3094_v3 = vpop.eup %3093  ;;  %v3440_v4 = vmul.f32 %v3092_v63, %v715_v44  ;;  %v785_v44 = vld [vmem:[#allocation7 + $0x140] sm:$0xff]  ;;  %v768_v45 = vld [vmem:[#allocation7 + $0xb8] sm:$0xff]  ;;  %v746_v63 = vld [vmem:[#allocation7 + $0x8] sm:$0xff] }
 0x216   :  { %v3444_v6 = vmul.f32 %v3094_v3, %v714_v33  ;;  %v741_v7 = vmul.f32 %v3094_v3, %v713_v31  ;;  %v772_v31 = vld [vmem:[#allocation7 + $0xd8] sm:$0xff]  ;;  %v761_v3 = vld [vmem:[#allocation7 + $0x80] sm:$0xff] }
 0x217   :  { %2884 = vmatprep.subr.mxu1 %v3436_v0  ;;  %2898 = vmatprep.subr.mxu0 %v3436_v0  ;;  %v756_v33 = vld [vmem:[#allocation7 + $0x58] sm:$0xff] }
 0x218   :  { %2885 = vmatpush3.msra.mxu1 %v3436_v0  ;;  %2899 = vmatpush3.msra.mxu0 %v3436_v0 }
 0x219   :  { %2886 = vmatprep.subr.mxu1 %v3440_v4  ;;  %2900 = vmatprep.subr.mxu0 %v3440_v4 }
 0x21a   :  { %2887 = vmatpush3.msra.mxu1 %v3440_v4  ;;  %2901 = vmatpush3.msra.mxu0 %v3440_v4 }
 0x21b   :  { %2888 = vmatprep.subr.mxu1 %v3444_v6  ;;  %2902 = vmatprep.subr.mxu0 %v3444_v6 }
 0x21c   :  { %2889 = vmatpush3.msra.mxu1 %v3444_v6  ;;  %2903 = vmatpush3.msra.mxu0 %v3444_v6 }
 0x21d   :  { %2890 = vmatprep.subr.mxu1 %v741_v7  ;;  %2904 = vmatprep.subr.mxu0 %v741_v7 }
 0x21e   :  { %2891 = vmatpush3.msra.mxu1 %v741_v7  ;;  %2905 = vmatpush3.msra.mxu0 %v741_v7 }
 0x21f   :  { %2893 = vmatmul.mubr.msk.f32.vlgmr.msra.gmra.mxu1 %vm321_vm3, %v3383_v25  ;;  %2907 = vmatmul.mubr.msk.f32.vlgmr.msra.gmra.mxu0 %vm321_vm3, %v3399_v28 }
 0x220   :  { %2895 = vmatprep.mubr.msk.f32.mxu1 %vm321_vm3, %v3393_v27  ;;  %2909 = vmatprep.mubr.msk.f32.mxu0 %vm321_vm3, %v3405_v30 }
 0x221   :  { %2562 = vmatprep.subr.mxu1 %v776_v8  ;;  %2912 = vmatprep.subr.mxu0 %v792_v11  ;;  %v745_v8 = vld [vmem:[#allocation7] sm:$0xff] }
 0x222   :  { %2563 = vmatpush3.msra.mxu1 %v760_v12  ;;  %2913 = vmatpush3.msra.mxu0 %v792_v11  ;;  %v778_v11 = vld [vmem:[#allocation7 + $0x108] sm:$0xff]  ;;  %v777_v12 = vld [vmem:[#allocation7 + $0x100] sm:$0xff] }
 0x223   :  { %2896 = vmatmul.mubr.msk.f32.gmra.mxu1 %vm321_vm3, %v3412_v32  ;;  %2910 = vmatmul.mubr.msk.f32.gmra.mxu0 %vm321_vm3, %v3419_v36 }
 0x224   :  { %1034 = vmatprep.mubr.f32.mxu1 %v741_v7  ;;  %2564 = vmatprep.subr.mxu1 %v775_v13  ;;  %v779_v7 = vld [vmem:[#allocation7 + $0x110] sm:$0xff] }
 0x225   :  { %2565 = vmatpush3.msra.mxu1 %v759_v14  ;;  %2914 = vmatprep.subr.mxu0 %v791_v15 }
 0x226   :  { %2566 = vmatprep.subr.mxu1 %v774_v19  ;;  %2915 = vmatpush3.msra.mxu0 %v791_v15 }
 0x227   :  { %2567 = vmatpush3.msra.mxu1 %v758_v20  ;;  %2916 = vmatprep.subr.mxu0 %v790_v21 }
 0x228   :  { %2568 = vmatprep.subr.mxu1 %v773_v23  ;;  %2917 = vmatpush3.msra.mxu0 %v790_v21 }
 0x229   :  { %2569 = vmatpush3.msra.mxu1 %v757_v24  ;;  %2918 = vmatprep.subr.mxu0 %v789_v29 }
 0x22a   :  { %2570 = vmatprep.subr.mxu1 %v772_v31  ;;  %2919 = vmatpush3.msra.mxu0 %v789_v29 }
 0x22b   :  { %2571 = vmatpush3.msra.mxu1 %v756_v33  ;;  %2920 = vmatprep.subr.mxu0 %v788_v34  ;;  %v2443_v33 = vld [vmem:[%s3589_s4] ss:$0 sm:$0xff] }
 0x22c   :  { %2572 = vmatprep.subr.mxu1 %v771_v35  ;;  %2921 = vmatpush3.msra.mxu0 %v788_v34 }
 0x22d   :  { %2573 = vmatpush3.msra.mxu1 %v755_v37  ;;  %2922 = vmatprep.subr.mxu0 %v787_v38 }
 0x22e   :  { %2574 = vmatprep.subr.mxu1 %v770_v39  ;;  %2923 = vmatpush3.msra.mxu0 %v787_v38 }
 0x22f   :  { %2575 = vmatpush3.msra.mxu1 %v754_v40  ;;  %2924 = vmatprep.subr.mxu0 %v786_v41 }
 0x230   :  { %2576 = vmatprep.subr.mxu1 %v769_v42  ;;  %2925 = vmatpush3.msra.mxu0 %v786_v41 }
 0x231   :  { %2577 = vmatpush3.msra.mxu1 %v753_v43  ;;  %2926 = vmatprep.subr.mxu0 %v785_v44 }
 0x232   :  { %2578 = vmatprep.subr.mxu1 %v768_v45  ;;  %2927 = vmatpush3.msra.mxu0 %v785_v44 }
 0x233   :  { %2579 = vmatpush3.msra.mxu1 %v752_v46  ;;  %2928 = vmatprep.subr.mxu0 %v784_v47 }
 0x234   :  { %2580 = vmatprep.subr.mxu1 %v767_v48  ;;  %2929 = vmatpush3.msra.mxu0 %v784_v47 }
 0x235   :  { %2581 = vmatpush3.msra.mxu1 %v751_v49  ;;  %2930 = vmatprep.subr.mxu0 %v783_v50 }
 0x236   :  { %2582 = vmatprep.subr.mxu1 %v766_v51  ;;  %2931 = vmatpush3.msra.mxu0 %v783_v50 }
 0x237   :  { %2583 = vmatpush3.msra.mxu1 %v750_v52  ;;  %2932 = vmatprep.subr.mxu0 %v782_v53 }
 0x238   :  { %2584 = vmatprep.subr.mxu1 %v765_v54  ;;  %2933 = vmatpush3.msra.mxu0 %v782_v53 }
 0x239   :  { %2585 = vmatpush3.msra.mxu1 %v749_v55  ;;  %2934 = vmatprep.subr.mxu0 %v781_v56 }
 0x23a   :  { %2586 = vmatprep.subr.mxu1 %v764_v57  ;;  %2935 = vmatpush3.msra.mxu0 %v781_v56 }
 0x23b   :  { %2587 = vmatpush3.msra.mxu1 %v748_v58  ;;  %2936 = vmatprep.subr.mxu0 %v780_v59 }
 0x23c   :  { %2588 = vmatprep.subr.mxu1 %v763_v60  ;;  %2937 = vmatpush3.msra.mxu0 %v780_v59 }
 0x23d   :  { %2589 = vmatpush3.msra.mxu1 %v747_v61  ;;  %2938 = vmatprep.subr.mxu0 %v779_v7 }
 0x23e   :  { %2590 = vmatprep.subr.mxu1 %v762_v62  ;;  %2939 = vmatpush3.msra.mxu0 %v779_v7 }
 0x23f   :  { %2591 = vmatpush3.msra.mxu1 %v746_v63  ;;  %2940 = vmatprep.subr.mxu0 %v778_v11 }
 0x240   :  { %2592 = vmatprep.subr.mxu1 %v761_v3  ;;  %2941 = vmatpush3.msra.mxu0 %v778_v11 }
 0x241   :  { %2593 = vmatpush3.msra.mxu1 %v745_v8  ;;  %2942 = vmatprep.subr.mxu0 %v777_v12 }
 0x242   :  { %2943 = vmatpush3.msra.mxu0 %v777_v12 }
 0x2df   :  { %v2894_v13 = vpop.f32.mrf.mxu1  ;;  %v2908_v14 = vpop.f32.mrf.mxu0 }
 0x2e1   :  { %v860_v15 = vpop.f32.mrf.mxu1  ;;  %v945_v19 = vpop.f32.mrf.mxu0 }
 0x2e2   :  { %1035 = vmatmul.mubr.f32.vlgmr.msra.gmra.mxu1 %v860_v15  ;;  %2944 = vmatprep.mubr.f32.mxu0 %v945_v19 }
 0x2e3   :  { %1039 = vmatprep.mubr.f32.mxu1 %v3444_v6  ;;  %2945 = vmatmul.mubr.f32.vlgmr.msra.gmra.mxu0 %v2908_v14  ;;  %v2911_v20 = vpop.f32.mrf.mxu0  ;;  %v2897_v21 = vpop.f32.mrf.mxu1 }
 0x2e5   :  { %v955_v23 = vpop.f32.mrf.mxu0  ;;  %v870_v24 = vpop.f32.mrf.mxu1 }
 0x2e6   :  { %1040 = vmatmul.mubr.f32.gmra.mxu1 %v2894_v13  ;;  %2947 = vmatprep.mubr.f32.mxu0 %v955_v23 }
 0x2e7   :  { %1044 = vmatprep.mubr.f32.mxu1 %v3440_v4  ;;  %2948 = vmatmul.mubr.f32.gmra.mxu0 %v2911_v20 }
 0x2e8   :  { %2958 = vmatprep.mubr.msk.f32.mxu0 %vm321_vm3, %v3355_v18 }
 0x2ea   :  { %1045 = vmatmul.mubr.f32.gmra.mxu1 %v870_v24 }
 0x2eb   :  { %1049 = vmatprep.mubr.f32.mxu1 %v3436_v0 }
 0x2ee   :  { %1050 = vmatmul.mubr.f32.gmra.mxu1 %v2897_v21 }
 0x2ef   :  { %2972 = vmatprep.mubr.msk.f32.mxu1 %vm321_vm3, %v3390_v26 }
 0x3a2   :  { %v2594_v6 = vpop.f32.mrf.mxu1 }
 0x3a3   :  { %v2946_v31 = vpop.f32.mrf.mxu0 }
 0x3a4   :  { %v2595_v29 = vpop.f32.mrf.mxu1 }
 0x3a5   :  { %v2596_v4 = vadd.f32 %v2595_v29, %v2594_v6  ;;  %v1121_v18 = vpop.f32.mrf.mxu0 }
 0x3a6   :  { %v2597_v34 = vpop.f32.mrf.mxu1 }
 0x3a7   :  { %v1037_v35 = vadd.f32 %v2596_v4, %v2443_v33  ;;  %v2949_v42 = vpop.f32.mrf.mxu0 }
 0x3a8   :  { %v2598_v37 = vpop.f32.mrf.mxu1 }
 0x3a9   :  { %v2599_v38 = vadd.f32 %v2598_v37, %v2597_v34  ;;  %v1122_v0 = vadd.f32 %v1121_v18, %v1037_v35  ;;  %v1131_v48 = vpop.f32.mrf.mxu0 }
 0x3aa   :  { %v2600_v39 = vpop.f32.mrf.mxu1 }
 0x3ab   :  { %v1042_v40 = vadd.f32 %v2599_v38, %v2443_v33  ;;  %v1140_v45 = vmax.f32 %v1122_v0, 0.0 }
 0x3ac   :  { %v2601_v41 = vpop.f32.mrf.mxu1 }
 0x3ad   :  { %v1127_v43 = vadd.f32 %v2946_v31, %v1042_v40  ;;  %v2602_v26 = vadd.f32 %v2601_v41, %v2600_v39 }
 0x3ae   :  { %v2603_v44 = vpop.f32.mrf.mxu1 }
 0x3af   :  { %v1141_v46 = vmax.f32 %v1127_v43, 0.0  ;;  %v1047_v47 = vadd.f32 %v2602_v26, %v2443_v33 }
 0x3b0   :  { %v2604_v49 = vpop.f32.mrf.mxu1 }
 0x3b1   :  { %v1144_v50 = vadd.f32 %v1141_v46, %v1140_v45  ;;  %v2605_v51 = vadd.f32 %v2604_v49, %v2603_v44  ;;  %v1132_v53 = vadd.f32 %v1131_v48, %v1047_v47 }
 0x3b3   :  { %v1145_v52 = vrot.slane %v1144_v50, 4  ;;  %v1052_v54 = vadd.f32 %v2605_v51, %v2443_v33  ;;  %v1142_v58 = vmax.f32 %v1132_v53, 0.0 }
 0x3b5   :  { %v1146_v55 = vadd.f32 %v1145_v52, %v1144_v50  ;;  %v1137_v56 = vadd.f32 %v2949_v42, %v1052_v54 }
 0x3b7   :  { %v1147_v57 = vrot.slane %v1146_v55, 2  ;;  %v1143_v59 = vmax.f32 %v1137_v56, 0.0 }
 0x3b9   :  { %v1148_v60 = vadd.f32 %v1147_v57, %v1146_v55  ;;  %v1151_v61 = vadd.f32 %v1143_v59, %v1142_v58  ;;  %v1226_v57 = vld [vmem:[#allocation8 + $0xf0] sm:$0xff] }
 0x3bb   :  { %v1149_v62 = vrot.slane %v1148_v60, 1  ;;  %v1152_v63 = vrot.slane %v1151_v61, 4 }
 0x3bd   :  { %v1150_v3 = vadd.f32 %v1149_v62, %v1148_v60  ;;  %v1153_v7 = vadd.f32 %v1152_v63, %v1151_v61  ;;  %v1208_v60 = vld [vmem:[#allocation8 + $0x60] sm:$0xff]  ;;  %v1223_v62 = vld [vmem:[#allocation8 + $0xd8] sm:$0xff] }
 0x3be   :  { %v1240_v61 = vld [vmem:[#allocation8 + $0x160] sm:$0xff]  ;;  %v1239_v63 = vld [vmem:[#allocation8 + $0x158] sm:$0xff] }
 0x3bf   :  { %v1158_v8 = vmul.f32 0.0625, %v1150_v3  ;;  %v1154_v11 = vrot.slane %v1153_v7, 2  ;;  %v1206_v3 = vld [vmem:[#allocation8 + $0x50] sm:$0xff] }
 0x3c1   :  { %v1160_v12 = vsub.f32 %v1140_v45, %v1158_v8  ;;  %v1161_v13 = vsub.f32 %v1141_v46, %v1158_v8  ;;  %v1155_v14 = vadd.f32 %v1154_v11, %v1153_v7  ;;  %v1238_v7 = vld [vmem:[#allocation8 + $0x150] sm:$0xff]  ;;  %v1221_v8 = vld [vmem:[#allocation8 + $0xc8] sm:$0xff] }
 0x3c2   :  { %v1205_v11 = vld [vmem:[#allocation8 + $0x48] sm:$0xff] }
 0x3c3   :  { %v1164_v15 = vmul.f32 %v1160_v12, %v1160_v12  ;;  %v1165_v19 = vmul.f32 %v1161_v13, %v1161_v13  ;;  %v1156_v20 = vrot.slane %v1155_v14, 1 }
 0x3c5   :  { %v1168_v21 = vadd.f32 %v1165_v19, %v1164_v15  ;;  %v1157_v23 = vadd.f32 %v1156_v20, %v1155_v14  ;;  %v1204_v14 = vld [vmem:[#allocation8 + $0x40] sm:$0xff]  ;;  %v1219_v19 = vld [vmem:[#allocation8 + $0xb8] sm:$0xff] }
 0x3c6   :  { %v1236_v15 = vld [vmem:[#allocation8 + $0x140] sm:$0xff]  ;;  %v1203_v20 = vld [vmem:[#allocation8 + $0x38] sm:$0xff] }
 0x3c7   :  { %v1169_v24 = vrot.slane %v1168_v21, 4  ;;  %v1159_v6 = vmul.f32 0.0625, %v1157_v23  ;;  %v1218_v23 = vld [vmem:[#allocation8 + $0xb0] sm:$0xff] }
 0x3c9   :  { %v1170_v29 = vadd.f32 %v1169_v24, %v1168_v21  ;;  %v1162_v31 = vsub.f32 %v1142_v58, %v1159_v6  ;;  %v1163_v33 = vsub.f32 %v1143_v59, %v1159_v6  ;;  %v1210_v58 = vld [vmem:[#allocation8 + $0x70] sm:$0xff]  ;;  %v1235_v21 = vld [vmem:[#allocation8 + $0x138] sm:$0xff] }
 0x3ca   :  { %v1242_v59 = vld [vmem:[#allocation8 + $0x170] sm:$0xff] }
 0x3cb   :  { %v1171_v4 = vrot.slane %v1170_v29, 2  ;;  %v1166_v34 = vmul.f32 %v1162_v31, %v1162_v31  ;;  %v1167_v35 = vmul.f32 %v1163_v33, %v1163_v33  ;;  %v1202_v24 = vld [vmem:[#allocation8 + $0x30] sm:$0xff] }
 0x3cc   :  { %v1234_v6 = vld [vmem:[#allocation8 + $0x130] sm:$0xff] }
 0x3cd   :  { %v1172_v37 = vadd.f32 %v1171_v4, %v1170_v29  ;;  %v1175_v18 = vadd.f32 %v1167_v35, %v1166_v34  ;;  %v1217_v29 = vld [vmem:[#allocation8 + $0xa8] sm:$0xff]  ;;  %v1216_v4 = vld [vmem:[#allocation8 + $0xa0] sm:$0xff] }
 0x3ce   :  { %v1200_v34 = vld [vmem:[#allocation8 + $0x20] sm:$0xff] }
 0x3cf   :  { %v1173_v38 = vrot.slane %v1172_v37, 1  ;;  %v1176_v39 = vrot.slane %v1175_v18, 4  ;;  %v1232_v35 = vld [vmem:[#allocation8 + $0x120] sm:$0xff] }
 0x3d1   :  { %v1177_v40 = vadd.f32 %v1176_v39, %v1175_v18  ;;  %v1174_v0 = vadd.f32 %v1173_v38, %v1172_v37  ;;  %v1215_v37 = vld [vmem:[#allocation8 + $0x98] sm:$0xff]  ;;  %v1214_v39 = vld [vmem:[#allocation8 + $0x90] sm:$0xff] }
 0x3d2   :  { %v1199_v18 = vld [vmem:[#allocation8 + $0x18] sm:$0xff] }
 0x3d3   :  { %v1178_v41 = vrot.slane %v1177_v40, 2  ;;  %v1182_v43 = vmul.f32 0.0625, %v1174_v0  ;;  %v1231_v38 = vld [vmem:[#allocation8 + $0x118] sm:$0xff]  ;;  %v1213_v0 = vld [vmem:[#allocation8 + $0x88] sm:$0xff] }
 0x3d5   :  { %v1179_v42 = vadd.f32 %v1178_v41, %v1177_v40  ;;  %v1184_v45 = vadd.f32 1e-05, %v1182_v43  ;;  %v1198_v40 = vld [vmem:[#allocation8 + $0x10] sm:$0xff]  ;;  %v1197_v41 = vld [vmem:[#allocation8 + $0x8] sm:$0xff] }
 0x3d6   :  { %v1230_v43 = vld [vmem:[#allocation8 + $0x110] sm:$0xff] }
 0x3d7   :  { %v1180_v26 = vrot.slane %v1179_v42, 1  ;;  %3095 = vrsqrt.f32 %v1184_v45  ;;  %v1228_v45 = vld [vmem:[#allocation8 + $0x100] sm:$0xff] }
 0x3d9   :  { %v1181_v44 = vadd.f32 %v1180_v26, %v1179_v42  ;;  %v1212_v42 = vld [vmem:[#allocation8 + $0x80] sm:$0xff] }
 0x3da   :  { %v1196_v26 = vld [vmem:[#allocation8] sm:$0xff] }
 0x3db   :  { %v1183_v46 = vmul.f32 0.0625, %v1181_v44  ;;  %v1229_v44 = vld [vmem:[#allocation8 + $0x108] sm:$0xff] }
 0x3dd   :  { %v1185_v47 = vadd.f32 1e-05, %v1183_v46 }
 0x3df   :  { %3097 = vrsqrt.f32 %v1185_v47 }
 0x3e4   :  { %v3096_v48 = vpop.eup %3095 }
 0x3e5   :  { %v1189_v52 = vmul.f32 %v3096_v48, %v1161_v13  ;;  %v1188_v54 = vmul.f32 %v3096_v48, %v1160_v12  ;;  %v1237_v12 = vld [vmem:[#allocation8 + $0x148] sm:$0xff]  ;;  %v1220_v13 = vld [vmem:[#allocation8 + $0xc0] sm:$0xff] }
 0x3e7   :  { %v3487_v56 = vadd.f32 %v1189_v52, %v3351_v16  ;;  %v1243_v16 = vld [vmem:[#allocation8 + $0x178] sm:$0xff] }
 0x3ec   :  { %v3098_v49 = vpop.eup %3097 }
 0x3ed   :  { %v1190_v50 = vmul.f32 %v3098_v49, %v1162_v31  ;;  %v1191_v51 = vmul.f32 %v3098_v49, %v1163_v33  ;;  %v1201_v31 = vld [vmem:[#allocation8 + $0x28] sm:$0xff] }
 0x3ee   :  { %v1233_v33 = vld [vmem:[#allocation8 + $0x128] sm:$0xff] }
 0x3ef   :  { %v3477_v53 = vadd.f32 %v1191_v51, %v3341_v9  ;;  %v3482_v55 = vadd.f32 %v1190_v50, %v3343_v10  ;;  %v1192_v9 = vadd.f32 %v1188_v54, %v3367_v22  ;;  %v1227_v10 = vld [vmem:[#allocation8 + $0xf8] sm:$0xff] }
 0x3f0   :  { %v1211_v22 = vld [vmem:[#allocation8 + $0x78] sm:$0xff] }
 0x3f1   :  { %2950 = vmatprep.subr.mxu0 %v3477_v53  ;;  %2964 = vmatprep.subr.mxu1 %v3477_v53 }
 0x3f2   :  { %2951 = vmatpush3.msra.mxu0 %v3477_v53  ;;  %2965 = vmatpush3.msra.mxu1 %v3477_v53 }
 0x3f3   :  { %2952 = vmatprep.subr.mxu0 %v3482_v55  ;;  %2966 = vmatprep.subr.mxu1 %v3482_v55 }
 0x3f4   :  { %2953 = vmatpush3.msra.mxu0 %v3482_v55  ;;  %2967 = vmatpush3.msra.mxu1 %v3482_v55 }
 0x3f5   :  { %2954 = vmatprep.subr.mxu0 %v3487_v56  ;;  %2968 = vmatprep.subr.mxu1 %v3487_v56 }
 0x3f6   :  { %2955 = vmatpush3.msra.mxu0 %v3487_v56  ;;  %2969 = vmatpush3.msra.mxu1 %v3487_v56 }
 0x3f7   :  { %2956 = vmatprep.subr.mxu0 %v1192_v9  ;;  %2970 = vmatprep.subr.mxu1 %v1192_v9 }
 0x3f8   :  { %2957 = vmatpush3.msra.mxu0 %v1192_v9  ;;  %2971 = vmatpush3.msra.mxu1 %v1192_v9 }
 0x3f9   :  { %2959 = vmatmul.mubr.msk.f32.vlgmr.msra.gmra.mxu0 %vm321_vm3, %v3383_v25  ;;  %2973 = vmatmul.mubr.msk.f32.vlgmr.msra.gmra.mxu1 %vm321_vm3, %v3399_v28  ;;  %v1225_v25 = vld [vmem:[#allocation8 + $0xe8] sm:$0xff] }
 0x3fa   :  { %2961 = vmatprep.mubr.msk.f32.mxu0 %vm321_vm3, %v3393_v27  ;;  %2975 = vmatprep.mubr.msk.f32.mxu1 %vm321_vm3, %v3405_v30  ;;  %v1209_v27 = vld [vmem:[#allocation8 + $0x68] sm:$0xff]  ;;  %v1224_v30 = vld [vmem:[#allocation8 + $0xe0] sm:$0xff] }
 0x3fb   :  { %2642 = vmatprep.subr.mxu0 %v1227_v10  ;;  %2978 = vmatprep.subr.mxu1 %v1243_v16  ;;  %v1241_v28 = vld [vmem:[#allocation8 + $0x168] sm:$0xff]  ;;  %v212_v10 = vand.u32 7, %v3328_v1 }
 0x3fc   :  { %2643 = vmatpush3.msra.mxu0 %v1211_v22  ;;  %2979 = vmatpush3.msra.mxu1 %v1243_v16 }
 0x3fd   :  { %2962 = vmatmul.mubr.msk.f32.gmra.mxu0 %vm321_vm3, %v3412_v32  ;;  %2976 = vmatmul.mubr.msk.f32.gmra.mxu1 %vm321_vm3, %v3419_v36  ;;  %v1207_v32 = vld [vmem:[#allocation8 + $0x58] sm:$0xff]  ;;  %v1222_v36 = vld [vmem:[#allocation8 + $0xd0] sm:$0xff]  ;;  %vm238_vm2 = vcmp.ne.s32.totalorder %v212_v10, 0  ;;  %vm264_vm7 = vcmp.ne.s32.totalorder %v212_v10, 7 }
 0x3fe   :  { %1485 = vmatprep.mubr.f32.mxu0 %v1192_v9  ;;  %2644 = vmatprep.subr.mxu0 %v1226_v57  ;;  %v3514_v9 = vmul.u32 2, %v3328_v1 }
 0x3ff   :  { %2645 = vmatpush3.msra.mxu0 %v1210_v58  ;;  %2980 = vmatprep.subr.mxu1 %v1242_v59 }
 0x400   :  { %2646 = vmatprep.subr.mxu0 %v1225_v25  ;;  %2981 = vmatpush3.msra.mxu1 %v1242_v59  ;;  %vm246_vm5 = vcmp.eq.s32.totalorder %v3330_v2, %v3514_v9  ;;  %v260_v1 = vadd.s32 2, %v3514_v9  ;;  %v2452_v59 = vld [vmem:[%s3591_s6] ss:$0 sm:$0xff] }
 0x401   :  { %2647 = vmatpush3.msra.mxu0 %v1209_v27  ;;  %2982 = vmatprep.subr.mxu1 %v1241_v28  ;;  %v3523_v16 = vsel %vm246_vm5, 1.0, %v3246_v17 }
 0x402   :  { %2648 = vmatprep.subr.mxu0 %v1224_v30  ;;  %2983 = vmatpush3.msra.mxu1 %v1241_v28  ;;  %vm262_vm6 = vcmp.eq.s32.totalorder %v3330_v2, %v260_v1 }
 0x403   :  { %2649 = vmatpush3.msra.mxu0 %v1208_v60  ;;  %2984 = vmatprep.subr.mxu1 %v1240_v61  ;;  %vm3530_vm8 = vmand %vm262_vm6, %vm264_vm7 }
 0x404   :  { %2650 = vmatprep.subr.mxu0 %v1223_v62  ;;  %2985 = vmatpush3.msra.mxu1 %v1240_v61 }
 0x405   :  { %2651 = vmatpush3.msra.mxu0 %v1207_v32  ;;  %2986 = vmatprep.subr.mxu1 %v1239_v63 }
 0x406   :  { %2652 = vmatprep.subr.mxu0 %v1222_v36  ;;  %2987 = vmatpush3.msra.mxu1 %v1239_v63 }
 0x407   :  { %2653 = vmatpush3.msra.mxu0 %v1206_v3  ;;  %2988 = vmatprep.subr.mxu1 %v1238_v7 }
 0x408   :  { %2654 = vmatprep.subr.mxu0 %v1221_v8  ;;  %2989 = vmatpush3.msra.mxu1 %v1238_v7 }
 0x409   :  { %2655 = vmatpush3.msra.mxu0 %v1205_v11  ;;  %2990 = vmatprep.subr.mxu1 %v1237_v12 }
 0x40a   :  { %2656 = vmatprep.subr.mxu0 %v1220_v13  ;;  %2991 = vmatpush3.msra.mxu1 %v1237_v12 }
 0x40b   :  { %2657 = vmatpush3.msra.mxu0 %v1204_v14  ;;  %2992 = vmatprep.subr.mxu1 %v1236_v15 }
 0x40c   :  { %2658 = vmatprep.subr.mxu0 %v1219_v19  ;;  %2993 = vmatpush3.msra.mxu1 %v1236_v15 }
 0x40d   :  { %2659 = vmatpush3.msra.mxu0 %v1203_v20  ;;  %2994 = vmatprep.subr.mxu1 %v1235_v21 }
 0x40e   :  { %2660 = vmatprep.subr.mxu0 %v1218_v23  ;;  %2995 = vmatpush3.msra.mxu1 %v1235_v21 }
 0x40f   :  { %2661 = vmatpush3.msra.mxu0 %v1202_v24  ;;  %2996 = vmatprep.subr.mxu1 %v1234_v6 }
 0x410   :  { %2662 = vmatprep.subr.mxu0 %v1217_v29  ;;  %2997 = vmatpush3.msra.mxu1 %v1234_v6 }
 0x411   :  { %2663 = vmatpush3.msra.mxu0 %v1201_v31  ;;  %2998 = vmatprep.subr.mxu1 %v1233_v33 }
 0x412   :  { %2664 = vmatprep.subr.mxu0 %v1216_v4  ;;  %2999 = vmatpush3.msra.mxu1 %v1233_v33 }
 0x413   :  { %2665 = vmatpush3.msra.mxu0 %v1200_v34  ;;  %3000 = vmatprep.subr.mxu1 %v1232_v35 }
 0x414   :  { %2666 = vmatprep.subr.mxu0 %v1215_v37  ;;  %3001 = vmatpush3.msra.mxu1 %v1232_v35 }
 0x415   :  { %2667 = vmatpush3.msra.mxu0 %v1199_v18  ;;  %3002 = vmatprep.subr.mxu1 %v1231_v38 }
 0x416   :  { %2668 = vmatprep.subr.mxu0 %v1214_v39  ;;  %3003 = vmatpush3.msra.mxu1 %v1231_v38 }
 0x417   :  { %2669 = vmatpush3.msra.mxu0 %v1198_v40  ;;  %3004 = vmatprep.subr.mxu1 %v1230_v43 }
 0x418   :  { %2670 = vmatprep.subr.mxu0 %v1213_v0  ;;  %3005 = vmatpush3.msra.mxu1 %v1230_v43 }
 0x419   :  { %2671 = vmatpush3.msra.mxu0 %v1197_v41  ;;  %3006 = vmatprep.subr.mxu1 %v1229_v44 }
 0x41a   :  { %2672 = vmatprep.subr.mxu0 %v1212_v42  ;;  %3007 = vmatpush3.msra.mxu1 %v1229_v44 }
 0x41b   :  { %2673 = vmatpush3.msra.mxu0 %v1196_v26  ;;  %3008 = vmatprep.subr.mxu1 %v1228_v45 }
 0x41c   :  { %3009 = vmatpush3.msra.mxu1 %v1228_v45 }
 0x4b9   :  { %v2960_v46 = vpop.f32.mrf.mxu0  ;;  %v2974_v47 = vpop.f32.mrf.mxu1 }
 0x4bb   :  { %v1311_v48 = vpop.f32.mrf.mxu0  ;;  %v1396_v49 = vpop.f32.mrf.mxu1 }
 0x4bc   :  { %1486 = vmatmul.mubr.f32.vlgmr.msra.gmra.mxu0 %v1311_v48  ;;  %3010 = vmatprep.mubr.f32.mxu1 %v1396_v49 }
 0x4bd   :  { %1490 = vmatprep.mubr.f32.mxu0 %v3487_v56  ;;  %3011 = vmatmul.mubr.f32.vlgmr.msra.gmra.mxu1 %v2974_v47  ;;  %v2977_v50 = vpop.f32.mrf.mxu1  ;;  %v2963_v51 = vpop.f32.mrf.mxu0  ;;  %v2416_v56 = vadd.s32 4294967295, %v3514_v9 }
 0x4bf   :  { %v1406_v52 = vpop.f32.mrf.mxu1  ;;  %v1321_v54 = vpop.f32.mrf.mxu0  ;;  %vm236_vm1 = vcmp.eq.s32.totalorder %v3330_v2, %v2416_v56 }
 0x4c0   :  { %1491 = vmatmul.mubr.f32.gmra.mxu0 %v2960_v46  ;;  %3013 = vmatprep.mubr.f32.mxu1 %v1406_v52  ;;  %vm240_vm4 = vmand %vm236_vm1, %vm238_vm2 }
 0x4c1   :  { %1495 = vmatprep.mubr.f32.mxu0 %v3482_v55  ;;  %3014 = vmatmul.mubr.f32.gmra.mxu1 %v2977_v50  ;;  %v2418_v55 = vsel %vm240_vm4, 1.0, %v3246_v17 }
 0x4c2   :  { %3024 = vmatprep.mubr.msk.f32.mxu1 %vm321_vm3, %v2418_v55 }
 0x4c4   :  { %1496 = vmatmul.mubr.f32.gmra.mxu0 %v1321_v54 }
 0x4c5   :  { %1500 = vmatprep.mubr.f32.mxu0 %v3477_v53  ;;  %v1658_v53 = vld [vmem:[#allocation10 + $0x78] sm:$0xff] }
 0x4c8   :  { %1501 = vmatmul.mubr.f32.gmra.mxu0 %v2963_v51 }
 0x4c9   :  { %3035 = vmatprep.mubr.msk.f32.mxu0 %vm321_vm3, %v3523_v16 }
 0x57c   :  { %v2674_v22 = vpop.f32.mrf.mxu0 }
 0x57d   :  { %v3012_v58 = vpop.f32.mrf.mxu1 }
 0x57e   :  { %v2675_v57 = vpop.f32.mrf.mxu0 }
 0x57f   :  { %v2676_v25 = vadd.f32 %v2675_v57, %v2674_v22  ;;  %v1572_v60 = vpop.f32.mrf.mxu1 }
 0x580   :  { %v2677_v27 = vpop.f32.mrf.mxu0 }
 0x581   :  { %v1488_v28 = vadd.f32 %v2676_v25, %v2452_v59  ;;  %v3015_v3 = vpop.f32.mrf.mxu1 }
 0x582   :  { %v2678_v30 = vpop.f32.mrf.mxu0 }
 0x583   :  { %v2679_v61 = vadd.f32 %v2678_v30, %v2677_v27  ;;  %v1573_v63 = vadd.f32 %v1572_v60, %v1488_v28  ;;  %v1582_v15 = vpop.f32.mrf.mxu1 }
 0x584   :  { %v2680_v62 = vpop.f32.mrf.mxu0 }
 0x585   :  { %v1493_v32 = vadd.f32 %v2679_v61, %v2452_v59  ;;  %v1591_v12 = vmax.f32 %v1573_v63, 0.0 }
 0x586   :  { %v2681_v36 = vpop.f32.mrf.mxu0 }
 0x587   :  { %v1578_v7 = vadd.f32 %v3012_v58, %v1493_v32  ;;  %v2682_v8 = vadd.f32 %v2681_v36, %v2680_v62  ;;  %v233_v36 = vmul.u32 2, %v3335_v5 }
 0x588   :  { %v2683_v11 = vpop.f32.mrf.mxu0 }
 0x589   :  { %v1592_v13 = vmax.f32 %v1578_v7, 0.0  ;;  %v1498_v14 = vadd.f32 %v2682_v8, %v2452_v59  ;;  %v2417_v7 = vadd.s32 4294967295, %v233_v36  ;;  %vm247_vm12 = vcmp.eq.s32.totalorder %v3330_v2, %v233_v36 }
 0x58a   :  { %v2684_v19 = vpop.f32.mrf.mxu0 }
 0x58b   :  { %v1595_v20 = vadd.f32 %v1592_v13, %v1591_v12  ;;  %v2685_v21 = vadd.f32 %v2684_v19, %v2683_v11  ;;  %v1583_v24 = vadd.f32 %v1582_v15, %v1498_v14  ;;  %vm237_vm9 = vcmp.eq.s32.totalorder %v3330_v2, %v2417_v7  ;;  %v1661_v7 = vld [vmem:[#allocation10 + $0x90] sm:$0xff] }
 0x58c   :  { %v261_v15 = vadd.s32 2, %v233_v36 }
 0x58d   :  { %v1596_v23 = vrot.slane %v1595_v20, 4  ;;  %v1503_v6 = vadd.f32 %v2685_v21, %v2452_v59  ;;  %v1593_v4 = vmax.f32 %v1583_v24, 0.0  ;;  %v252_v21 = vadd.s32 1, %v3514_v9 }
 0x58e   :  { %vm263_vm13 = vcmp.eq.s32.totalorder %v3330_v2, %v261_v15  ;;  %v2424_v9 = vsel %vm3530_vm8, 1.0, %v3246_v17  ;;  %v1679_v15 = vld [vmem:[#allocation10 + $0x120] sm:$0xff] }
 0x58f   :  { %v1597_v29 = vadd.f32 %v1596_v23, %v1595_v20  ;;  %v1588_v31 = vadd.f32 %v3015_v3, %v1503_v6  ;;  %v219_v3 = vand.u32 7, %v3335_v5  ;;  %v3543_v20 = vsel %vm247_vm12, 1.0, %v3246_v17 }
 0x590   :  { %v253_v23 = vadd.s32 1, %v233_v36  ;;  %vm254_vm15 = vcmp.eq.s32.totalorder %v3330_v2, %v252_v21  ;;  %v1662_v36 = vld [vmem:[#allocation10 + $0x98] sm:$0xff] }
 0x591   :  { %v1598_v33 = vrot.slane %v1597_v29, 2  ;;  %v1594_v34 = vmax.f32 %v1588_v31, 0.0  ;;  %vm239_vm10 = vcmp.ne.s32.totalorder %v219_v3, 0  ;;  %vm265_vm14 = vcmp.ne.s32.totalorder %v219_v3, 7  ;;  %v1706_v31 = vld [vmem:[#allocation10 + $0x1f8] sm:$0xff] }
 0x592   :  { %vm241_vm11 = vmand %vm237_vm9, %vm239_vm10  ;;  %vm255_vm1 = vcmp.eq.s32.totalorder %v3330_v2, %v253_v23  ;;  %v3556_v24 = vsel %vm254_vm15, 1.0, %v3246_v17  ;;  %v1674_v2 = vld [vmem:[#allocation10 + $0xf8] sm:$0xff] }
 0x593   :  { %v1599_v35 = vadd.f32 %v1598_v33, %v1597_v29  ;;  %v1602_v37 = vadd.f32 %v1594_v34, %v1593_v4  ;;  %v2419_v19 = vsel %vm241_vm11, 1.0, %v3246_v17  ;;  %vm267_vm0 = vmand %vm263_vm13, %vm265_vm14  ;;  %v3560_v29 = vsel %vm255_vm1, 1.0, %v3246_v17  ;;  %v1690_v33 = vld [vmem:[#allocation10 + $0x178] sm:$0xff] }
 0x594   :  { %v2425_v6 = vsel %vm267_vm0, 1.0, %v3246_v17  ;;  %v1657_v17 = vld [vmem:[#allocation10 + $0x70] sm:$0xff]  ;;  %v1646_v3 = vld [vmem:[#allocation10 + $0x18] sm:$0xff] }
 0x595   :  { %v1600_v18 = vrot.slane %v1599_v35, 1  ;;  %v1603_v38 = vrot.slane %v1602_v37, 4  ;;  %v1694_v21 = vld [vmem:[#allocation10 + $0x198] sm:$0xff] }
 0x596   :  { %v1678_v23 = vld [vmem:[#allocation10 + $0x118] sm:$0xff] }
 0x597   :  { %v1601_v39 = vadd.f32 %v1600_v18, %v1599_v35  ;;  %v1604_v40 = vadd.f32 %v1603_v38, %v1602_v37  ;;  %v1689_v35 = vld [vmem:[#allocation10 + $0x170] sm:$0xff]  ;;  %v1672_v37 = vld [vmem:[#allocation10 + $0xe8] sm:$0xff] }
 0x598   :  { %v1704_v18 = vld [vmem:[#allocation10 + $0x1e8] sm:$0xff] }
 0x599   :  { %v1609_v0 = vmul.f32 0.0625, %v1601_v39  ;;  %v1605_v41 = vrot.slane %v1604_v40, 2  ;;  %v1656_v38 = vld [vmem:[#allocation10 + $0x68] sm:$0xff] }
 0x59a   :  { %v1688_v39 = vld [vmem:[#allocation10 + $0x168] sm:$0xff] }
 0x59b   :  { %v1611_v42 = vsub.f32 %v1591_v12, %v1609_v0  ;;  %v1612_v43 = vsub.f32 %v1592_v13, %v1609_v0  ;;  %v1606_v26 = vadd.f32 %v1605_v41, %v1604_v40  ;;  %v1671_v40 = vld [vmem:[#allocation10 + $0xe0] sm:$0xff] }
 0x59c   :  { %v1703_v0 = vld [vmem:[#allocation10 + $0x1e0] sm:$0xff] }
 0x59d   :  { %v1615_v44 = vmul.f32 %v1611_v42, %v1611_v42  ;;  %v1616_v45 = vmul.f32 %v1612_v43, %v1612_v43  ;;  %v1607_v46 = vrot.slane %v1606_v26, 1  ;;  %v1655_v41 = vld [vmem:[#allocation10 + $0x60] sm:$0xff] }
 0x59f   :  { %v1619_v47 = vadd.f32 %v1616_v45, %v1615_v44  ;;  %v1608_v48 = vadd.f32 %v1607_v46, %v1606_v26  ;;  %v1702_v26 = vld [vmem:[#allocation10 + $0x1d8] sm:$0xff]  ;;  %v1669_v46 = vld [vmem:[#allocation10 + $0xd0] sm:$0xff] }
 0x5a0   :  { %v1654_v44 = vld [vmem:[#allocation10 + $0x58] sm:$0xff] }
 0x5a1   :  { %v1620_v49 = vrot.slane %v1619_v47, 4  ;;  %v1610_v50 = vmul.f32 0.0625, %v1608_v48  ;;  %v1686_v45 = vld [vmem:[#allocation10 + $0x158] sm:$0xff]  ;;  %v1653_v48 = vld [vmem:[#allocation10 + $0x50] sm:$0xff] }
 0x5a3   :  { %v1621_v51 = vadd.f32 %v1620_v49, %v1619_v47  ;;  %v1613_v52 = vsub.f32 %v1593_v4, %v1610_v50  ;;  %v1614_v54 = vsub.f32 %v1594_v34, %v1610_v50  ;;  %v1673_v4 = vld [vmem:[#allocation10 + $0xf0] sm:$0xff]  ;;  %v1668_v50 = vld [vmem:[#allocation10 + $0xc8] sm:$0xff] }
 0x5a4   :  { %v1705_v34 = vld [vmem:[#allocation10 + $0x1f0] sm:$0xff] }
 0x5a5   :  { %v1622_v10 = vrot.slane %v1621_v51, 2  ;;  %v1617_v56 = vmul.f32 %v1613_v52, %v1613_v52  ;;  %v1618_v55 = vmul.f32 %v1614_v54, %v1614_v54  ;;  %v1701_v47 = vld [vmem:[#allocation10 + $0x1d0] sm:$0xff] }
 0x5a6   :  { %v1685_v49 = vld [vmem:[#allocation10 + $0x150] sm:$0xff] }
 0x5a7   :  { %v1623_v1 = vadd.f32 %v1622_v10, %v1621_v51  ;;  %v1626_v22 = vadd.f32 %v1618_v55, %v1617_v56  ;;  %v1700_v51 = vld [vmem:[#allocation10 + $0x1c8] sm:$0xff]  ;;  %v1667_v10 = vld [vmem:[#allocation10 + $0xc0] sm:$0xff] }
 0x5a8   :  { %v1699_v56 = vld [vmem:[#allocation10 + $0x1c0] sm:$0xff] }
 0x5a9   :  { %v1627_v57 = vrot.slane %v1626_v22, 4  ;;  %v1624_v58 = vrot.slane %v1623_v1, 1  ;;  %v1651_v55 = vld [vmem:[#allocation10 + $0x40] sm:$0xff] }
 0x5ab   :  { %v1628_v59 = vadd.f32 %v1627_v57, %v1626_v22  ;;  %v1625_v27 = vadd.f32 %v1624_v58, %v1623_v1  ;;  %v1683_v1 = vld [vmem:[#allocation10 + $0x140] sm:$0xff]  ;;  %v1666_v22 = vld [vmem:[#allocation10 + $0xb8] sm:$0xff] }
 0x5ac   :  { %v1698_v57 = vld [vmem:[#allocation10 + $0x1b8] sm:$0xff] }
 0x5ad   :  { %v1629_v25 = vrot.slane %v1628_v59, 2  ;;  %v1633_v60 = vmul.f32 0.0625, %v1625_v27  ;;  %v1650_v58 = vld [vmem:[#allocation10 + $0x38] sm:$0xff]  ;;  %v1697_v27 = vld [vmem:[#allocation10 + $0x1b0] sm:$0xff] }
 0x5af   :  { %v1630_v28 = vadd.f32 %v1629_v25, %v1628_v59  ;;  %v1635_v32 = vadd.f32 1e-05, %v1633_v60  ;;  %v1682_v59 = vld [vmem:[#allocation10 + $0x138] sm:$0xff]  ;;  %v1665_v25 = vld [vmem:[#allocation10 + $0xb0] sm:$0xff]  ;;  %v1664_v60 = vld [vmem:[#allocation10 + $0xa8] sm:$0xff] }
 0x5b1   :  { %v1631_v30 = vrot.slane %v1630_v28, 1 }
 0x5b3   :  { %v1632_v61 = vadd.f32 %v1631_v30, %v1630_v28  ;;  %v1649_v28 = vld [vmem:[#allocation10 + $0x30] sm:$0xff] }
 0x5b4   :  { %v1681_v30 = vld [vmem:[#allocation10 + $0x130] sm:$0xff] }
 0x5b5   :  { %v1634_v62 = vmul.f32 0.0625, %v1632_v61  ;;  %v1696_v61 = vld [vmem:[#allocation10 + $0x1a8] sm:$0xff] }
 0x5b7   :  { %v1636_v63 = vadd.f32 1e-05, %v1634_v62  ;;  %v1648_v62 = vld [vmem:[#allocation10 + $0x28] sm:$0xff] }
 0x5b9   :  { %3099 = vrsqrt.f32 %v1636_v63  ;;  %v1647_v63 = vld [vmem:[#allocation10 + $0x20] sm:$0xff] }
 0x5ba   :  { %3101 = vrsqrt.f32 %v1635_v32  ;;  %v1663_v32 = vld [vmem:[#allocation10 + $0xa0] sm:$0xff] }
 0x5c6   :  { %v3100_v8 = vpop.eup %3099 }
 0x5c7   :  { %v1642_v11 = vmul.f32 %v3100_v8, %v1614_v54  ;;  %v3102_v12 = vpop.eup %3101  ;;  %v1641_v13 = vmul.f32 %v3100_v8, %v1613_v52  ;;  %v1652_v52 = vld [vmem:[#allocation10 + $0x48] sm:$0xff]  ;;  %v1645_v8 = vld [vmem:[#allocation10 + $0x10] sm:$0xff] }
 0x5c8   :  { %v1640_v14 = vmul.f32 %v3102_v12, %v1612_v43  ;;  %v1639_v5 = vmul.f32 %v3102_v12, %v1611_v42  ;;  %v1687_v42 = vld [vmem:[#allocation10 + $0x160] sm:$0xff]  ;;  %v1670_v43 = vld [vmem:[#allocation10 + $0xd8] sm:$0xff]  ;;  %v1684_v54 = vld [vmem:[#allocation10 + $0x148] sm:$0xff] }
 0x5c9   :  { %3016 = vmatprep.subr.mxu1 %v1642_v11  ;;  %3027 = vmatprep.subr.mxu0 %v1642_v11  ;;  %v1680_v12 = vld [vmem:[#allocation10 + $0x128] sm:$0xff] }
 0x5ca   :  { %3017 = vmatpush3.msra.mxu1 %v1642_v11  ;;  %3028 = vmatpush3.msra.mxu0 %v1642_v11 }
 0x5cb   :  { %3018 = vmatprep.subr.mxu1 %v1641_v13  ;;  %3029 = vmatprep.subr.mxu0 %v1641_v13 }
 0x5cc   :  { %3019 = vmatpush3.msra.mxu1 %v1641_v13  ;;  %3030 = vmatpush3.msra.mxu0 %v1641_v13 }
 0x5cd   :  { %3020 = vmatprep.subr.mxu1 %v1640_v14  ;;  %3031 = vmatprep.subr.mxu0 %v1640_v14 }
 0x5ce   :  { %3021 = vmatpush3.msra.mxu1 %v1640_v14  ;;  %3032 = vmatpush3.msra.mxu0 %v1640_v14 }
 0x5cf   :  { %3022 = vmatprep.subr.mxu1 %v1639_v5  ;;  %3033 = vmatprep.subr.mxu0 %v1639_v5 }
 0x5d0   :  { %3023 = vmatpush3.msra.mxu1 %v1639_v5  ;;  %3034 = vmatpush3.msra.mxu0 %v1639_v5 }
 0x5d1   :  { %3038 = vmatprep.subr.mxu1 %v1642_v11  ;;  %3049 = vmatprep.subr.mxu0 %v1642_v11 }
 0x5d2   :  { %3025 = vmatmul.mubr.msk.f32.vlgmr.msra.gmra.mxu1 %vm321_vm3, %v2419_v19  ;;  %3036 = vmatmul.mubr.msk.f32.vlgmr.msra.gmra.mxu0 %vm321_vm3, %v3543_v20  ;;  %v1643_v19 = vld [vmem:[#allocation10] sm:$0xff] }
 0x5d3   :  { %3039 = vmatpush3.msra.mxu1 %v1642_v11  ;;  %3050 = vmatpush3.msra.mxu0 %v1642_v11  ;;  %v1660_v11 = vld [vmem:[#allocation10 + $0x88] sm:$0xff] }
 0x5d4   :  { %3040 = vmatprep.subr.mxu1 %v1641_v13  ;;  %3051 = vmatprep.subr.mxu0 %v1641_v13 }
 0x5d5   :  { %3041 = vmatpush3.msra.mxu1 %v1641_v13  ;;  %3052 = vmatpush3.msra.mxu0 %v1641_v13  ;;  %v1644_v13 = vld [vmem:[#allocation10 + $0x8] sm:$0xff] }
 0x5d6   :  { %3042 = vmatprep.subr.mxu1 %v1640_v14  ;;  %3053 = vmatprep.subr.mxu0 %v1640_v14 }
 0x5d7   :  { %3043 = vmatpush3.msra.mxu1 %v1640_v14  ;;  %3054 = vmatpush3.msra.mxu0 %v1640_v14  ;;  %v1695_v14 = vld [vmem:[#allocation10 + $0x1a0] sm:$0xff] }
 0x5d8   :  { %3044 = vmatprep.subr.mxu1 %v1639_v5  ;;  %3055 = vmatprep.subr.mxu0 %v1639_v5 }
 0x5d9   :  { %3045 = vmatpush3.msra.mxu1 %v1639_v5  ;;  %3056 = vmatpush3.msra.mxu0 %v1639_v5  ;;  %v1659_v5 = vld [vmem:[#allocation10 + $0x80] sm:$0xff] }
 0x5da   :  { %3057 = vmatprep.mubr.msk.f32.mxu0 %vm321_vm3, %v2424_v9  ;;  %3046 = vmatprep.mubr.msk.f32.mxu1 %vm321_vm3, %v3556_v24  ;;  %v1693_v9 = vld [vmem:[#allocation10 + $0x190] sm:$0xff] }
 0x5db   :  { %3058 = vmatmul.mubr.msk.f32.vlgmr.msra.gmra.mxu0 %vm321_vm3, %v2425_v6  ;;  %3047 = vmatmul.mubr.msk.f32.vlgmr.msra.gmra.mxu1 %vm321_vm3, %v3560_v29  ;;  %v1677_v6 = vld [vmem:[#allocation10 + $0x110] sm:$0xff] }
 0x5dc   :  { %2730 = vmatprep.subr.mxu1 %v1674_v2  ;;  %2768 = vmatprep.subr.mxu0 %v1706_v31  ;;  %v3107_v2 = vld [vmem:[#allocation2 + $0x18] sm:$0xff]  ;;  %v1692_v31 = vld [vmem:[#allocation10 + $0x188] sm:$0xff] }
 0x5dd   :  { %2731 = vmatpush3.msra.mxu1 %v1658_v53  ;;  %2769 = vmatpush3.msra.mxu0 %v1690_v33  ;;  %v1676_v53 = vld [vmem:[#allocation10 + $0x108] sm:$0xff]  ;;  %v1691_v33 = vld [vmem:[#allocation10 + $0x180] sm:$0xff] }
 0x5de   :  { %2732 = vmatprep.subr.mxu1 %v1673_v4  ;;  %2770 = vmatprep.subr.mxu0 %v1705_v34  ;;  %v1675_v4 = vld [vmem:[#allocation10 + $0x100] sm:$0xff] }
 0x5df   :  { %2733 = vmatpush3.msra.mxu1 %v1657_v17  ;;  %2771 = vmatpush3.msra.mxu0 %v1689_v35 }
 0x5e0   :  { %2734 = vmatprep.subr.mxu1 %v1672_v37  ;;  %2772 = vmatprep.subr.mxu0 %v1704_v18  ;;  %v3108_v18 = vld [vmem:[#allocation2 + $0x10] sm:$0xff] }
 0x5e1   :  { %2735 = vmatpush3.msra.mxu1 %v1656_v38  ;;  %2773 = vmatpush3.msra.mxu0 %v1688_v39  ;;  %v3109_v38 = vld [vmem:[#allocation2 + $0x8] sm:$0xff] }
 0x5e2   :  { %2736 = vmatprep.subr.mxu1 %v1671_v40  ;;  %2774 = vmatprep.subr.mxu0 %v1703_v0  ;;  %v3110_v0 = vld [vmem:[#allocation2] sm:$0xff] }
 0x5e3   :  { %2737 = vmatpush3.msra.mxu1 %v1655_v41  ;;  %2775 = vmatpush3.msra.mxu0 %v1687_v42 }
 0x5e4   :  { %2738 = vmatprep.subr.mxu1 %v1670_v43  ;;  %2776 = vmatprep.subr.mxu0 %v1702_v26 }
 0x5e5   :  { %2739 = vmatpush3.msra.mxu1 %v1654_v44  ;;  %2777 = vmatpush3.msra.mxu0 %v1686_v45  ;;  %v2461_v44 = vld [vmem:[%s3593_s8] ss:$0 sm:$0xff]  ;;  %s3247_s8 = smov [#allocation11]  }
 0x5e6   :  { %2740 = vmatprep.subr.mxu1 %v1669_v46  ;;  %2778 = vmatprep.subr.mxu0 %v1701_v47  ;;  %s2390_s17 = sshll.u32 %s3247_s8, 4  ;;  %s2391_s17 = int_to_ptr.vmem [resolvable:$true] %s2390_s17 }
 0x5e7   :  { %2741 = vmatpush3.msra.mxu1 %v1653_v48  ;;  %2779 = vmatpush3.msra.mxu0 %v1685_v49  ;;  %s3211_s18 = scalar_lea.vmem %s2391_s17, 256  ;;  %p3216_p12 = scmp.lt.s32.totalorder %s2391_s17, %s2391_s17 }
 0x5e8   :  { %2742 = vmatprep.subr.mxu1 %v1668_v50  ;;  %2780 = vmatprep.subr.mxu0 %v1700_v51  ;;  %p3212_p11 = scmp.ne.s32.totalorder %s2391_s17, %s3211_s18  ;;  %p3217_p13 = scmp.lt.s32.totalorder %s3211_s18, %s3211_s18 }
 0x5e9   :  { %2743 = vmatpush3.msra.mxu1 %v1652_v52  ;;  %2781 = vmatpush3.msra.mxu0 %v1684_v54 }
 0x5ea   :  { %2744 = vmatprep.subr.mxu1 %v1667_v10  ;;  %2782 = vmatprep.subr.mxu0 %v1699_v56  ;;  %p3218_p0 = por %p3217_p13, %p3216_p12 }
 0x5eb   :  { %2745 = vmatpush3.msra.mxu1 %v1651_v55  ;;  %2783 = vmatpush3.msra.mxu0 %v1683_v1 }
 0x5ec   :  { %2746 = vmatprep.subr.mxu1 %v1666_v22  ;;  %2784 = vmatprep.subr.mxu0 %v1698_v57  ;;  %p3219_p1 = pnand %p3218_p0, %p3212_p11 }
 0x5ed   :  { %2747 = vmatpush3.msra.mxu1 %v1650_v58  ;;  %2785 = vmatpush3.msra.mxu0 %v1682_v59 }
 0x5ee   :  { %2748 = vmatprep.subr.mxu1 %v1665_v25  ;;  %2786 = vmatprep.subr.mxu0 %v1697_v27 }
 0x5ef   :  { %2749 = vmatpush3.msra.mxu1 %v1649_v28  ;;  %2787 = vmatpush3.msra.mxu0 %v1681_v30 }
 0x5f0   :  { %2750 = vmatprep.subr.mxu1 %v1664_v60  ;;  %2788 = vmatprep.subr.mxu0 %v1696_v61 }
 0x5f1   :  { %2751 = vmatpush3.msra.mxu1 %v1648_v62  ;;  %2789 = vmatpush3.msra.mxu0 %v1680_v12 }
 0x5f2   :  { %2752 = vmatprep.subr.mxu1 %v1663_v32  ;;  %2790 = vmatprep.subr.mxu0 %v1695_v14 }
 0x5f3   :  { %2753 = vmatpush3.msra.mxu1 %v1647_v63  ;;  %2791 = vmatpush3.msra.mxu0 %v1679_v15 }
 0x5f4   :  { %2754 = vmatprep.subr.mxu1 %v1662_v36  ;;  %2792 = vmatprep.subr.mxu0 %v1694_v21 }
 0x5f5   :  { %2755 = vmatpush3.msra.mxu1 %v1646_v3  ;;  %2793 = vmatpush3.msra.mxu0 %v1678_v23 }
 0x5f6   :  { %2756 = vmatprep.subr.mxu1 %v1661_v7  ;;  %2794 = vmatprep.subr.mxu0 %v1693_v9 }
 0x5f7   :  { %2757 = vmatpush3.msra.mxu1 %v1645_v8  ;;  %2795 = vmatpush3.msra.mxu0 %v1677_v6 }
 0x5f8   :  { %2758 = vmatprep.subr.mxu1 %v1660_v11  ;;  %2796 = vmatprep.subr.mxu0 %v1692_v31 }
 0x5f9   :  { %2759 = vmatpush3.msra.mxu1 %v1644_v13  ;;  %2797 = vmatpush3.msra.mxu0 %v1676_v53 }
 0x5fa   :  { %2760 = vmatprep.subr.mxu1 %v1659_v5  ;;  %2798 = vmatprep.subr.mxu0 %v1691_v33 }
 0x5fb   :  { %2761 = vmatpush3.msra.mxu1 %v1643_v19  ;;  %2799 = vmatpush3.msra.mxu0 %v1675_v4 }
 0x5fc   :  { %3060 = vmatprep.subr.mxu1 %v3107_v2  ;;  %3071 = vmatprep.subr.mxu0 %v3107_v2 }
 0x692   :  { %v3037_v34 = vpop.f32.mrf.mxu0  ;;  %v3026_v17 = vpop.f32.mrf.mxu1 }
 0x694   :  { %v1861_v35 = vpop.f32.mrf.mxu0  ;;  %v1780_v37 = vpop.f32.mrf.mxu1 }
 0x695   :  { %2102 = vmatprep.mubr.f32.mxu1 %v1861_v35 }
 0x696   :  { %2103 = vmatmul.mubr.f32.vlgmr.msra.gmra.mxu1 %v1780_v37 }
 0x697   :  { %2107 = vmatprep.mubr.f32.mxu1 %v3037_v34  ;;  %3061 = vmatpush3.msra.mxu1 %v3107_v2 }
 0x698   :  { %3062 = vmatprep.subr.mxu1 %v3108_v18 }
 0x699   :  { %3063 = vmatpush3.msra.mxu1 %v3108_v18 }
 0x69a   :  { %2108 = vmatmul.mubr.f32.gmra.mxu1 %v3026_v17  ;;  %3064 = vmatprep.subr.mxu1 %v3109_v38 }
 0x69b   :  { %v3059_v39 = vpop.f32.mrf.mxu0  ;;  %v3048_v40 = vpop.f32.mrf.mxu1  ;;  %3065 = vmatpush3.msra.mxu1 %v3109_v38  ;;  %3068 = vmatprep.mubr.msk.f32.mxu1 %vm321_vm3, %v3556_v24 }
 0x69c   :  { %3066 = vmatprep.subr.mxu1 %v3110_v0 }
 0x69d   :  { %v2023_v41 = vpop.f32.mrf.mxu0  ;;  %v1942_v42 = vpop.f32.mrf.mxu1  ;;  %3067 = vmatpush3.msra.mxu1 %v3110_v0 }
 0x69e   :  { %2177 = vmatprep.mubr.f32.mxu0 %v2023_v41  ;;  %3069 = vmatmul.mubr.msk.f32.vlgmr.msra.gmra.mxu1 %vm321_vm3, %v3560_v29 }
 0x69f   :  { %2178 = vmatmul.mubr.f32.vlgmr.msra.gmra.mxu0 %v1942_v42 }
 0x6a0   :  { %2182 = vmatprep.mubr.f32.mxu0 %v3059_v39  ;;  %3072 = vmatpush3.msra.mxu0 %v3107_v2 }
 0x6a1   :  { %3073 = vmatprep.subr.mxu0 %v3108_v18 }
 0x6a2   :  { %3074 = vmatpush3.msra.mxu0 %v3108_v18 }
 0x6a3   :  { %2183 = vmatmul.mubr.f32.gmra.mxu0 %v3048_v40  ;;  %3075 = vmatprep.subr.mxu0 %v3109_v38 }
 0x6a4   :  { %3076 = vmatpush3.msra.mxu0 %v3109_v38  ;;  %3079 = vmatprep.mubr.msk.f32.mxu0 %vm321_vm3, %v3523_v16 }
 0x6a5   :  { %3077 = vmatprep.subr.mxu0 %v3110_v0 }
 0x6a6   :  { %3078 = vmatpush3.msra.mxu0 %v3110_v0 }
 0x6a7   :  { %3080 = vmatmul.mubr.msk.f32.vlgmr.msra.gmra.mxu0 %vm321_vm3, %v3543_v20 }
 0x756   :  { %v2762_v24 = vpop.f32.mrf.mxu1 }
 0x758   :  { %v2763_v43 = vpop.f32.mrf.mxu1 }
 0x759   :  { %v2764_v29 = vadd.f32 %v2763_v43, %v2762_v24 }
 0x75a   :  { %v2765_v26 = vpop.f32.mrf.mxu1 }
 0x75b   :  { %v2105_v48 = vadd.f32 %v2764_v29, %v2461_v44 }
 0x75c   :  { %v2766_v45 = vpop.f32.mrf.mxu1 }
 0x75d   :  { %v2767_v49 = vadd.f32 %v2766_v45, %v2765_v26 }
 0x75e   :  { %v3070_v4 = vpop.f32.mrf.mxu1 }
 0x75f   :  { %v2800_v46 = vpop.f32.mrf.mxu0  ;;  %v2110_v54 = vadd.f32 %v2767_v49, %v2461_v44 }
 0x760   :  { %v2295_v35 = vpop.f32.mrf.mxu1 }
 0x761   :  { %v2801_v47 = vpop.f32.mrf.mxu0 }
 0x762   :  { %v2802_v50 = vadd.f32 %v2801_v47, %v2800_v46 }
 0x763   :  { %v2803_v16 = vpop.f32.mrf.mxu0 }
 0x764   :  { %v2180_v51 = vadd.f32 %v2802_v50, %v2105_v48 }
 0x765   :  { %v2804_v52 = vpop.f32.mrf.mxu0 }
 0x766   :  { %v2188_v10 = vmax.f32 %v2180_v51, 0.0  ;;  %v2805_v20 = vadd.f32 %v2804_v52, %v2803_v16 }
 0x767   :  { %v3081_v34 = vpop.f32.mrf.mxu0 }
 0x768   :  { %v2190_v56 = vrot.slane %v2188_v10, 4  ;;  %v2185_v55 = vadd.f32 %v2805_v20, %v2110_v54  ;;  %v2376_v40 = vadd.f32 %v3081_v34, %v3070_v4 }
 0x769   :  { %v2370_v37 = vpop.f32.mrf.mxu0 }
 0x76a   :  { %v2191_v1 = vadd.f32 %v2190_v56, %v2188_v10  ;;  %v2189_v22 = vmax.f32 %v2185_v55, 0.0  ;;  %v2371_v18 = vadd.f32 %v2370_v37, %v2295_v35  ;;  %v2380_v43 = vmul.f32 0.5, %v2376_v40 }
 0x76c   :  { %v2192_v57 = vrot.slane %v2191_v1, 2  ;;  %v2196_v58 = vrot.slane %v2189_v22, 4  ;;  %v2379_v38 = vmul.f32 0.5, %v2371_v18 }
 0x76e   :  { %v2193_v59 = vadd.f32 %v2192_v57, %v2191_v1  ;;  %v2197_v25 = vadd.f32 %v2196_v58, %v2189_v22 }
 0x770   :  { %v2198_v27 = vrot.slane %v2197_v25, 2  ;;  %v2194_v28 = vrot.slane %v2193_v59, 1 }
 0x772   :  { %v2199_v30 = vadd.f32 %v2198_v27, %v2197_v25  ;;  %v2195_v60 = vadd.f32 %v2194_v28, %v2193_v59 }
 0x774   :  { %v2200_v61 = vrot.slane %v2199_v30, 1  ;;  %v2203_v62 = vmul.f32 0.125, %v2195_v60 }
 0x776   :  { %v2201_v32 = vadd.f32 %v2200_v61, %v2199_v30  ;;  %v2205_v63 = vsub.f32 %v2188_v10, %v2203_v62 }
 0x778   :  { %v2204_v36 = vmul.f32 0.125, %v2201_v32  ;;  %v2207_v3 = vmul.f32 %v2205_v63, %v2205_v63 }
 0x77a   :  { %v2206_v7 = vsub.f32 %v2189_v22, %v2204_v36  ;;  %v2209_v8 = vrot.slane %v2207_v3, 4 }
 0x77c   :  { %v2208_v11 = vmul.f32 %v2206_v7, %v2206_v7  ;;  %v2210_v12 = vadd.f32 %v2209_v8, %v2207_v3 }
 0x77e   :  { %v2215_v13 = vrot.slane %v2208_v11, 4  ;;  %v2211_v14 = vrot.slane %v2210_v12, 2 }
 0x780   :  { %v2216_v5 = vadd.f32 %v2215_v13, %v2208_v11  ;;  %v2212_v15 = vadd.f32 %v2211_v14, %v2210_v12 }
 0x782   :  { %v2217_v19 = vrot.slane %v2216_v5, 2  ;;  %v2213_v21 = vrot.slane %v2212_v15, 1 }
 0x784   :  { %v2218_v23 = vadd.f32 %v2217_v19, %v2216_v5  ;;  %v2214_v9 = vadd.f32 %v2213_v21, %v2212_v15 }
 0x786   :  { %v2219_v6 = vrot.slane %v2218_v23, 1  ;;  %v2221_v2 = vmul.f32 0.125, %v2214_v9 }
 0x788   :  { %v2220_v31 = vadd.f32 %v2219_v6, %v2218_v23  ;;  %v2223_v53 = vadd.f32 1e-05, %v2221_v2 }
 0x78a   :  { %v2222_v33 = vmul.f32 0.125, %v2220_v31  ;;  %3103 = vrsqrt.f32 %v2223_v53 }
 0x78c   :  { %v2224_v17 = vadd.f32 1e-05, %v2222_v33 }
 0x78e   :  { %3105 = vrsqrt.f32 %v2224_v17 }
 0x797   :  { %v3104_v39 = vpop.eup %3103 }
 0x798   :  { %v2227_v0 = vmul.f32 %v3104_v39, %v2205_v63 }
 0x79a   :  { %v2381_v41 = vadd.f32 %v2379_v38, %v2227_v0 }
 0x79b   :  { %v3106_v42 = vpop.eup %3105 }
 0x79c   :  { %v2228_v24 = vmul.f32 %v3106_v42, %v2206_v7  ;;  %2383 = vst [vmem:[#allocation11] sm:$0xff] %v2381_v41 }
 0x79e   :  { %v2382_v26 = vadd.f32 %v2380_v43, %v2228_v24 }
 0x7a0   :  { %2384 = vst [vmem:[#allocation11 + $0x8] sm:$0xff] %v2382_v26 }
 0x7a1   :  { %3222 = shalt.err (!%p3219_p1)
}
 0x7a2   :  { %2396 = dma.vmem_to_hbm [thread:$0]  %s2391_s17, 256, %s3594_s9, [#allocation4], %s3241_s14, %s3241_s14, %s3242_s15  }
 0x7a3   :  { %3237 = dma.done.wait [#allocation4], 256  }
 0x7a4   :  { %3238 = vsyncadd [#allocation4], 4294967040 }
 0x7a5   :  { %2400 = vsyncpa [#allocation3], 1 }
 0x7a6   :  { %2401 = vsyncpa [#allocation6], 1 }
 0x7a7   :  { %2402 = vsyncpa [#allocation9], 1 }
 0x7a8   :  { %2403 = vsyncpa [#allocation4], 1 }

</bundles_post_ra>
